<compile_context>
chip_gen: v7x
topology: tpu7x:2x2x1
jax: 0.10.0
libtpu: 0.0.40
codegen_flags: <defaults>
</compile_context>

<pallas_src>
import jax
import jax.numpy as jnp
from jax.experimental import pallas as pl
from jax.experimental.pallas import tpu as pltpu


def _round_up(n: int, m: int) -> int:
    return ((n + m - 1) // m) * m


def _mlp5_kernel(x_ref,
                 w1_ref, b1_ref,
                 w2_ref, b2_ref,
                 w3_ref, b3_ref,
                 w4_ref, b4_ref,
                 w5_ref, b5_ref,
                 o_ref):
    # Activations / weights are bf16 (native MXU dtype); accumulate in f32,
    # do bias-add + ReLU in f32 on the VPU, then re-quantize to bf16 for the
    # next MXU pass. dropout(p=0.0) is the identity -> no-op.
    x = x_ref[...]

    h = jnp.dot(x, w1_ref[...], preferred_element_type=jnp.float32) + b1_ref[...]
    h = jnp.maximum(h, 0.0).astype(jnp.bfloat16)        # relu(linear1)

    h = jnp.dot(h, w2_ref[...], preferred_element_type=jnp.float32) + b2_ref[...]
    h = jnp.maximum(h, 0.0).astype(jnp.bfloat16)        # relu(linear2)

    h = jnp.dot(h, w3_ref[...], preferred_element_type=jnp.float32) + b3_ref[...]
    h = jnp.maximum(h, 0.0).astype(jnp.bfloat16)        # relu(linear3)

    h = jnp.dot(h, w4_ref[...], preferred_element_type=jnp.float32) + b4_ref[...]
    h = jnp.maximum(h, 0.0).astype(jnp.bfloat16)        # relu(linear4)

    out = jnp.dot(h, w5_ref[...], preferred_element_type=jnp.float32) + b5_ref[...]
    o_ref[...] = out.astype(o_ref.dtype)                # linear5 (no activation)


def net_ann_5_no_bn_forward(x, params, *, batch_tile=512):
    """Fused 5-layer MLP forward.

    x: [B, n_in] float32
    params: dict with w1..w5 ([in, out] layout, float32) and b1..b5 ([1, out]).
    Returns [B, n_out] float32.
    """
    B, n_in = x.shape
    n_out = params["w5"].shape[1]

    # Lane-dense padding for the feature dims (128-lane vregs / MXU width).
    n_in_p = _round_up(n_in, 128)
    n_out_p = _round_up(n_out, 128)

    # Batch tile: as large as requested but never more than the (8-rounded)
    # batch, and always a multiple of 8 sublanes.
    bt = max(8, min(batch_tile, _round_up(B, 8)))
    bt = _round_up(bt, 8)
    B_p = _round_up(B, bt)
    grid = (B_p // bt,)

    # --- wrapper-side padding / dtype prep (zeros don't change the math) ---
    x_p = x
    if (B_p, n_in_p) != (B, n_in):
        x_p = jnp.pad(x, ((0, B_p - B), (0, n_in_p - n_in)))
    x_p = x_p.astype(jnp.bfloat16)

    w1 = jnp.pad(params["w1"], ((0, n_in_p - n_in), (0, 0))).astype(jnp.bfloat16)
    w2 = params["w2"].astype(jnp.bfloat16)
    w3 = params["w3"].astype(jnp.bfloat16)
    w4 = params["w4"].astype(jnp.bfloat16)
    w5 = jnp.pad(params["w5"], ((0, 0), (0, n_out_p - n_out))).astype(jnp.bfloat16)

    b1 = params["b1"].astype(jnp.float32)
    b2 = params["b2"].astype(jnp.float32)
    b3 = params["b3"].astype(jnp.float32)
    b4 = params["b4"].astype(jnp.float32)
    b5 = jnp.pad(params["b5"], ((0, 0), (0, n_out_p - n_out))).astype(jnp.float32)

    weights = [w1, b1, w2, b2, w3, b3, w4, b4, w5, b5]

    # Weights/biases: one full block, replicated across the batch grid
    # (index_map returns block (0,0) every step -> stays VMEM-resident).
    def resident(arr):
        return pl.BlockSpec(arr.shape, lambda i: (0, 0))

    in_specs = [pl.BlockSpec((bt, n_in_p), lambda i: (i, 0))]
    in_specs += [resident(a) for a in weights]
    out_spec = pl.BlockSpec((bt, n_out_p), lambda i: (i, 0))

    fn = pl.pallas_call(
        _mlp5_kernel,
        out_shape=jax.ShapeDtypeStruct((B_p, n_out_p), jnp.float32),
        grid_spec=pltpu.PrefetchScalarGridSpec(
            num_scalar_prefetch=0,
            grid=grid,
            in_specs=in_specs,
            out_specs=out_spec,
        ),
        compiler_params=pltpu.CompilerParams(
            dimension_semantics=("parallel",),
        ),
    )

    out_p = fn(x_p, *weights)
    return out_p[:B, :n_out]


def init_params(key, n_in, n_out, neurons=128):
    """Deterministic init mimicking nn.Linear default (uniform +/- 1/sqrt(fan_in)).

    Weights are stored transposed relative to PyTorch: [in_features, out_features].
    Biases are stored as [1, out_features].
    """
    dims = [(n_in, neurons), (neurons, neurons), (neurons, neurons),
            (neurons, neurons), (neurons, n_out)]
    params = {}
    for idx, (fan_in, fan_out) in enumerate(dims, start=1):
        key, kw, kb = jax.random.split(key, 3)
        bound = 1.0 / jnp.sqrt(jnp.float32(fan_in))
        params[f"w{idx}"] = jax.random.uniform(
            kw, (fan_in, fan_out), jnp.float32, minval=-bound, maxval=bound)
        params[f"b{idx}"] = jax.random.uniform(
            kb, (1, fan_out), jnp.float32, minval=-bound, maxval=bound)
    return params


def reference_forward_f32(x, params):
    """Plain-JAX f32 reference of the PyTorch forward (dropout p=0.0 -> identity)."""
    h = jnp.maximum(x @ params["w1"] + params["b1"], 0.0)
    h = jnp.maximum(h @ params["w2"] + params["b2"], 0.0)
    h = jnp.maximum(h @ params["w3"] + params["b3"], 0.0)
    h = jnp.maximum(h @ params["w4"] + params["b4"], 0.0)
    return h @ params["w5"] + params["b5"]


def reference_forward_bf16(x, params):
    """Reference with the same bf16-in / f32-accumulate quantization the kernel uses."""
    def dot(a, w):
        return jnp.dot(a.astype(jnp.bfloat16), w.astype(jnp.bfloat16),
                       preferred_element_type=jnp.float32)
    h = jnp.maximum(dot(x, params["w1"]) + params["b1"], 0.0)
    h = jnp.maximum(dot(h, params["w2"]) + params["b2"], 0.0)
    h = jnp.maximum(dot(h, params["w3"]) + params["b3"], 0.0)
    h = jnp.maximum(dot(h, params["w4"]) + params["b4"], 0.0)
    return dot(h, params["w5"]) + params["b5"]


if __name__ == "__main__":
    key = jax.random.PRNGKey(0)
    k_params, k_x = jax.random.split(key)

    # Small, module-consistent shapes. batch_tile=256 -> grid of 2 steps so the
    # parallel batch axis can be sharded across both v7x TensorCores.
    batch = 512
    n_in = 64
    n_out = 64
    neurons = 128

    params = init_params(k_params, n_in, n_out, neurons=neurons)
    x = jax.random.normal(k_x, (batch, n_in), dtype=jnp.float32)

    out = net_ann_5_no_bn_forward(x, params, batch_tile=256)
    out = jax.block_until_ready(out)
    assert out.shape == (batch, n_out)

    # 1) Tight check vs a reference using the same bf16/f32 quantization
    #    (verifies the kernel's numerics / padding / tiling).
    ref_q = reference_forward_bf16(x, params)
    assert jnp.allclose(out, ref_q, atol=2e-3, rtol=2e-3), "mismatch vs bf16 reference"

    # 2) Looser check vs the pure-f32 PyTorch-equivalent forward
    #    (verifies module semantics; slack covers bf16 matmul quantization).
    ref_f32 = reference_forward_f32(x, params)
    assert jnp.allclose(out, ref_f32, atol=1e-1, rtol=1e-1), "mismatch vs f32 reference"

    print("KERNEL_OK")
</pallas_src>

<mosaic_0001>
module attributes {stable_mosaic.version = 11 : i64} {
  func.func @_mlp5_kernel(%arg0: i32, %arg1: memref<256x128xbf16, #tpu.memory_space<vmem>>, %arg2: memref<128x128xbf16, #tpu.memory_space<vmem>>, %arg3: memref<1x128xf32, #tpu.memory_space<vmem>>, %arg4: memref<128x128xbf16, #tpu.memory_space<vmem>>, %arg5: memref<1x128xf32, #tpu.memory_space<vmem>>, %arg6: memref<128x128xbf16, #tpu.memory_space<vmem>>, %arg7: memref<1x128xf32, #tpu.memory_space<vmem>>, %arg8: memref<128x128xbf16, #tpu.memory_space<vmem>>, %arg9: memref<1x128xf32, #tpu.memory_space<vmem>>, %arg10: memref<128x128xbf16, #tpu.memory_space<vmem>>, %arg11: memref<1x128xf32, #tpu.memory_space<vmem>>, %arg12: memref<256x128xf32, #tpu.memory_space<vmem>>) attributes {dimension_semantics = [#tpu.dimension_semantics<parallel>], iteration_bounds = array<i64: 2>, scalar_prefetch = 0 : i64, scratch_operands = 0 : i64, tpu.core_type = #tpu.core_type<tc>, window_params = [{transform_indices = @transform_0, window_bounds = array<i64: 256, 128>}, {pipeline_mode = #tpu.pipeline_mode<synchronous>, transform_indices = @transform_1, window_bounds = array<i64: 128, 128>}, {pipeline_mode = #tpu.pipeline_mode<synchronous>, transform_indices = @transform_2, window_bounds = array<i64: 1, 128>}, {pipeline_mode = #tpu.pipeline_mode<synchronous>, transform_indices = @transform_3, window_bounds = array<i64: 128, 128>}, {pipeline_mode = #tpu.pipeline_mode<synchronous>, transform_indices = @transform_4, window_bounds = array<i64: 1, 128>}, {pipeline_mode = #tpu.pipeline_mode<synchronous>, transform_indices = @transform_5, window_bounds = array<i64: 128, 128>}, {pipeline_mode = #tpu.pipeline_mode<synchronous>, transform_indices = @transform_6, window_bounds = array<i64: 1, 128>}, {pipeline_mode = #tpu.pipeline_mode<synchronous>, transform_indices = @transform_7, window_bounds = array<i64: 128, 128>}, {pipeline_mode = #tpu.pipeline_mode<synchronous>, transform_indices = @transform_8, window_bounds = array<i64: 1, 128>}, {pipeline_mode = #tpu.pipeline_mode<synchronous>, transform_indices = @transform_9, window_bounds = array<i64: 128, 128>}, {pipeline_mode = #tpu.pipeline_mode<synchronous>, transform_indices = @transform_10, window_bounds = array<i64: 1, 128>}, {transform_indices = @transform_11, window_bounds = array<i64: 256, 128>}]} {
    %c0 = arith.constant 0 : index
    %c0_0 = arith.constant 0 : index
    %0 = vector.load %arg1[%c0, %c0_0] : memref<256x128xbf16, #tpu.memory_space<vmem>>, vector<256x128xbf16>
    %c0_1 = arith.constant 0 : index
    %c0_2 = arith.constant 0 : index
    %1 = vector.load %arg2[%c0_1, %c0_2] : memref<128x128xbf16, #tpu.memory_space<vmem>>, vector<128x128xbf16>
    %cst = arith.constant dense<0.000000e+00> : vector<256x128xf32>
    %2 = tpu.matmul %0, %1, %cst {dimension_numbers = #tpu.dot_dimension_numbers<[1], [0], [0], [1], [0, 0, 1, 1], [], []>} : vector<256x128xbf16>, vector<128x128xbf16>, vector<256x128xf32> -> vector<256x128xf32>
    %c0_3 = arith.constant 0 : index
    %c0_4 = arith.constant 0 : index
    %3 = vector.load %arg3[%c0_3, %c0_4] : memref<1x128xf32, #tpu.memory_space<vmem>>, vector<1x128xf32>
    %4 = vector.broadcast %3 : vector<1x128xf32> to vector<256x128xf32>
    %5 = arith.addf %2, %4 : vector<256x128xf32>
    %cst_5 = arith.constant 0.000000e+00 : f32
    %6 = vector.broadcast %cst_5 : f32 to vector<256x128xf32>
    %7 = arith.maximumf %5, %6 : vector<256x128xf32>
    %8 = arith.truncf %7 : vector<256x128xf32> to vector<256x128xbf16>
    %c0_6 = arith.constant 0 : index
    %c0_7 = arith.constant 0 : index
    %9 = vector.load %arg4[%c0_6, %c0_7] : memref<128x128xbf16, #tpu.memory_space<vmem>>, vector<128x128xbf16>
    %cst_8 = arith.constant dense<0.000000e+00> : vector<256x128xf32>
    %10 = tpu.matmul %8, %9, %cst_8 {dimension_numbers = #tpu.dot_dimension_numbers<[1], [0], [0], [1], [0, 0, 1, 1], [], []>} : vector<256x128xbf16>, vector<128x128xbf16>, vector<256x128xf32> -> vector<256x128xf32>
    %c0_9 = arith.constant 0 : index
    %c0_10 = arith.constant 0 : index
    %11 = vector.load %arg5[%c0_9, %c0_10] : memref<1x128xf32, #tpu.memory_space<vmem>>, vector<1x128xf32>
    %12 = vector.broadcast %11 : vector<1x128xf32> to vector<256x128xf32>
    %13 = arith.addf %10, %12 : vector<256x128xf32>
    %cst_11 = arith.constant 0.000000e+00 : f32
    %14 = vector.broadcast %cst_11 : f32 to vector<256x128xf32>
    %15 = arith.maximumf %13, %14 : vector<256x128xf32>
    %16 = arith.truncf %15 : vector<256x128xf32> to vector<256x128xbf16>
    %c0_12 = arith.constant 0 : index
    %c0_13 = arith.constant 0 : index
    %17 = vector.load %arg6[%c0_12, %c0_13] : memref<128x128xbf16, #tpu.memory_space<vmem>>, vector<128x128xbf16>
    %cst_14 = arith.constant dense<0.000000e+00> : vector<256x128xf32>
    %18 = tpu.matmul %16, %17, %cst_14 {dimension_numbers = #tpu.dot_dimension_numbers<[1], [0], [0], [1], [0, 0, 1, 1], [], []>} : vector<256x128xbf16>, vector<128x128xbf16>, vector<256x128xf32> -> vector<256x128xf32>
    %c0_15 = arith.constant 0 : index
    %c0_16 = arith.constant 0 : index
    %19 = vector.load %arg7[%c0_15, %c0_16] : memref<1x128xf32, #tpu.memory_space<vmem>>, vector<1x128xf32>
    %20 = vector.broadcast %19 : vector<1x128xf32> to vector<256x128xf32>
    %21 = arith.addf %18, %20 : vector<256x128xf32>
    %cst_17 = arith.constant 0.000000e+00 : f32
    %22 = vector.broadcast %cst_17 : f32 to vector<256x128xf32>
    %23 = arith.maximumf %21, %22 : vector<256x128xf32>
    %24 = arith.truncf %23 : vector<256x128xf32> to vector<256x128xbf16>
    %c0_18 = arith.constant 0 : index
    %c0_19 = arith.constant 0 : index
    %25 = vector.load %arg8[%c0_18, %c0_19] : memref<128x128xbf16, #tpu.memory_space<vmem>>, vector<128x128xbf16>
    %cst_20 = arith.constant dense<0.000000e+00> : vector<256x128xf32>
    %26 = tpu.matmul %24, %25, %cst_20 {dimension_numbers = #tpu.dot_dimension_numbers<[1], [0], [0], [1], [0, 0, 1, 1], [], []>} : vector<256x128xbf16>, vector<128x128xbf16>, vector<256x128xf32> -> vector<256x128xf32>
    %c0_21 = arith.constant 0 : index
    %c0_22 = arith.constant 0 : index
    %27 = vector.load %arg9[%c0_21, %c0_22] : memref<1x128xf32, #tpu.memory_space<vmem>>, vector<1x128xf32>
    %28 = vector.broadcast %27 : vector<1x128xf32> to vector<256x128xf32>
    %29 = arith.addf %26, %28 : vector<256x128xf32>
    %cst_23 = arith.constant 0.000000e+00 : f32
    %30 = vector.broadcast %cst_23 : f32 to vector<256x128xf32>
    %31 = arith.maximumf %29, %30 : vector<256x128xf32>
    %32 = arith.truncf %31 : vector<256x128xf32> to vector<256x128xbf16>
    %c0_24 = arith.constant 0 : index
    %c0_25 = arith.constant 0 : index
    %33 = vector.load %arg10[%c0_24, %c0_25] : memref<128x128xbf16, #tpu.memory_space<vmem>>, vector<128x128xbf16>
    %cst_26 = arith.constant dense<0.000000e+00> : vector<256x128xf32>
    %34 = tpu.matmul %32, %33, %cst_26 {dimension_numbers = #tpu.dot_dimension_numbers<[1], [0], [0], [1], [0, 0, 1, 1], [], []>} : vector<256x128xbf16>, vector<128x128xbf16>, vector<256x128xf32> -> vector<256x128xf32>
    %c0_27 = arith.constant 0 : index
    %c0_28 = arith.constant 0 : index
    %35 = vector.load %arg11[%c0_27, %c0_28] : memref<1x128xf32, #tpu.memory_space<vmem>>, vector<1x128xf32>
    %36 = vector.broadcast %35 : vector<1x128xf32> to vector<256x128xf32>
    %37 = arith.addf %34, %36 : vector<256x128xf32>
    %c0_29 = arith.constant 0 : index
    %c0_30 = arith.constant 0 : index
    %38 = vector.load %arg12[%c0_29, %c0_30] : memref<256x128xf32, #tpu.memory_space<vmem>>, vector<256x128xf32>
    tpu.vector_store %arg12[%c0_29, %c0_30], %37 {strides = array<i32>} : memref<256x128xf32, #tpu.memory_space<vmem>>, vector<256x128xf32>,
    return
  }
  func.func @transform_0(%arg0: i32) -> (i32, i32) {
    %c0_i32 = arith.constant 0 : i32
    %c0_i32_0 = arith.constant 0 : i32
    return %arg0, %c0_i32 : i32, i32
  }
  func.func @transform_1(%arg0: i32) -> (i32, i32) {
    %c0_i32 = arith.constant 0 : i32
    %c0_i32_0 = arith.constant 0 : i32
    %c0_i32_1 = arith.constant 0 : i32
    return %c0_i32, %c0_i32_0 : i32, i32
  }
  func.func @transform_2(%arg0: i32) -> (i32, i32) {
    %c0_i32 = arith.constant 0 : i32
    %c0_i32_0 = arith.constant 0 : i32
    %c0_i32_1 = arith.constant 0 : i32
    return %c0_i32, %c0_i32_0 : i32, i32
  }
  func.func @transform_3(%arg0: i32) -> (i32, i32) {
    %c0_i32 = arith.constant 0 : i32
    %c0_i32_0 = arith.constant 0 : i32
    %c0_i32_1 = arith.constant 0 : i32
    return %c0_i32, %c0_i32_0 : i32, i32
  }
  func.func @transform_4(%arg0: i32) -> (i32, i32) {
    %c0_i32 = arith.constant 0 : i32
    %c0_i32_0 = arith.constant 0 : i32
    %c0_i32_1 = arith.constant 0 : i32
    return %c0_i32, %c0_i32_0 : i32, i32
  }
  func.func @transform_5(%arg0: i32) -> (i32, i32) {
    %c0_i32 = arith.constant 0 : i32
    %c0_i32_0 = arith.constant 0 : i32
    %c0_i32_1 = arith.constant 0 : i32
    return %c0_i32, %c0_i32_0 : i32, i32
  }
  func.func @transform_6(%arg0: i32) -> (i32, i32) {
    %c0_i32 = arith.constant 0 : i32
    %c0_i32_0 = arith.constant 0 : i32
    %c0_i32_1 = arith.constant 0 : i32
    return %c0_i32, %c0_i32_0 : i32, i32
  }
  func.func @transform_7(%arg0: i32) -> (i32, i32) {
    %c0_i32 = arith.constant 0 : i32
    %c0_i32_0 = arith.constant 0 : i32
    %c0_i32_1 = arith.constant 0 : i32
    return %c0_i32, %c0_i32_0 : i32, i32
  }
  func.func @transform_8(%arg0: i32) -> (i32, i32) {
    %c0_i32 = arith.constant 0 : i32
    %c0_i32_0 = arith.constant 0 : i32
    %c0_i32_1 = arith.constant 0 : i32
    return %c0_i32, %c0_i32_0 : i32, i32
  }
  func.func @transform_9(%arg0: i32) -> (i32, i32) {
    %c0_i32 = arith.constant 0 : i32
    %c0_i32_0 = arith.constant 0 : i32
    %c0_i32_1 = arith.constant 0 : i32
    return %c0_i32, %c0_i32_0 : i32, i32
  }
  func.func @transform_10(%arg0: i32) -> (i32, i32) {
    %c0_i32 = arith.constant 0 : i32
    %c0_i32_0 = arith.constant 0 : i32
    %c0_i32_1 = arith.constant 0 : i32
    return %c0_i32, %c0_i32_0 : i32, i32
  }
  func.func @transform_11(%arg0: i32) -> (i32, i32) {
    %c0_i32 = arith.constant 0 : i32
    %c0_i32_0 = arith.constant 0 : i32
    return %arg0, %c0_i32 : i32, i32
  }
}

</mosaic_0001>

<bundles_post_ra>
// kernel: tpu_custom_call.1
= control target key start
LH: loop header
LB: loop body
LE: loop exit
PB: predicated region body
PF: predicated region fallthrough
CT: control target
= control target key end

     0   :  { %s3639_s0 = inlined_call_operand.hbm [shape: bf16[512,128], index: 0, kind: input, shape index: {}]   ;;  %s3640_s1 = inlined_call_operand.hbm [shape: bf16[128,128], index: 1, kind: input, shape index: {}]   ;;  %s3641_s2 = inlined_call_operand.vmem [shape: f32[1,128], index: 2, kind: input, shape index: {}]   ;;  %s3642_s3 = inlined_call_operand.hbm [shape: bf16[128,128], index: 3, kind: input, shape index: {}]   ;;  %s3643_s4 = inlined_call_operand.vmem [shape: f32[1,128], index: 4, kind: input, shape index: {}]   ;;  %s3644_s5 = inlined_call_operand.hbm [shape: bf16[128,128], index: 5, kind: input, shape index: {}]   ;;  %s3645_s6 = inlined_call_operand.vmem [shape: f32[1,128], index: 6, kind: input, shape index: {}]   ;;  %s3646_s7 = inlined_call_operand.hbm [shape: bf16[128,128], index: 7, kind: input, shape index: {}]   ;;  %s3647_s8 = inlined_call_operand.vmem [shape: f32[1,128], index: 8, kind: input, shape index: {}]   ;;  %s3648_s9 = inlined_call_operand.hbm [shape: bf16[128,128], index: 9, kind: input, shape index: {}]   ;;  %s3649_s10 = inlined_call_operand.vmem [shape: f32[1,128], index: 10, kind: input, shape index: {}]   ;;  %s3650_s11 = inlined_call_operand.hbm [shape: f32[512,128], index: 11, kind: output, shape index: {}]  }
   0x1   :  { %3656 = sst [smem:[#allocation19_spill]] %s3640_s1 }
   0x2   :  { %3657 = sst [smem:[#allocation20_spill]] %s3647_s8 }
   0x3   :  { %3658 = sst [smem:[#allocation21_spill]] %s3649_s10 }
   0x4   :  { %3659 = sst [smem:[#allocation22_spill]] %s3650_s11 }
   0x5   :  { %16 = vsyncpa [#allocation3], 0 }
   0x6   :  { %18 = vsyncpa [#allocation3 + $0x1], 0 }
   0x7   :  { %19 = vsyncpa [#allocation6], 0 }
   0x8   :  { %20 = vsyncpa [#allocation9], 0 }
   0x9   :  { %21 = vsyncpa [#allocation12], 0 }
   0xa   :  { %22 = vsyncpa [#allocation4], 0 }
   0xb   :  { %24 = vsyncpa [#allocation4 + $0x1], 0  ;;  %s3069_s17 = smov 0   ;;  %s3071_s18 = smov 0  }
   0xc   :  { %s3073_s19 = smov 0   ;;  %s3075_s20 = smov 0  }
   0xd LB: > { %s2998_s21 = smov [#allocation5]   ;;  %s3090_s23 = sadd.s32 4294967295, %s2996_s20   ;;  %s2996_s20 = sphi %s3075_s20, %s3686_s20   ;;  %s2992_s19 = sphi %s3073_s19, %s3685_s19   ;;  %s2988_s18 = sphi %s3071_s18, %s3684_s18   ;;  %s2984_s17 = sphi %s3069_s17, %s3683_s17  }
   0xe   : > { %s309_s22 = sshll.u32 %s2998_s21, 4  ;;  %p2129_p0 = scmp.ge.s32.totalorder %s2996_s20, 1  ;;  %s3095_s22 = int_to_ptr.vmem [resolvable:$true] %s309_s22 }
   0xf   : > { %p3652_p1 = scmp.eq.s32.totalorder %s3090_s23, 0  ;;  %p297_p2 = scmp.lt.s32.totalorder %s2996_s20, 3 }
  0x10   : > { %s2999_s25 = smov [#allocation8]   ;;  %s3000_s28 = smov [#allocation7]  }
  0x11   : > { %p3097_p3 = pnand %p2129_p0, %p297_p2  ;;  %s341_s26 = sshll.u32 %s2999_s25, 4  ;;  %s3110_s26 = int_to_ptr.vmem [resolvable:$true] %s341_s26 }
  0x12   : > { %s325_s29 = sshll.u32 %s3000_s28, 4  ;;  %s3662_s1 = sld [smem:[#allocation19_spill]]  ;;  %s3112_s29 = int_to_ptr.vmem [resolvable:$true] %s325_s29 }
  0x13   : > { %s3660_s24 = scalar_select %p3097_p3, 1, 0 }
  0x14   : > { %p2615_p5 = pneg %p3097_p3 }
  0x16   : > { %p3106_p6 = pnand %p2615_p5, %p3652_p1 }
  0x18   : > { %s2748_s13 = scalar_lea.hbm %s3662_s1, 1024  ;;  %p3122_p8 = pneg %p3106_p6 }
  0x19   : > { %p2749_p7 = scmp.ne.s32.totalorder %s3662_s1, %s2748_s13  ;;  %p2755_p11 = scmp.lt.u32.totalorder %s2748_s13, %s3662_s1 }
  0x1b   : > { %p2751_p9 = pnand %p3122_p8, %p2749_p7 }
  0x1d   : > { %p2752_p10 = pneg %p2751_p9 }
  0x1f   : > { %p2757_p12 = pnand %p2755_p11, %p2752_p10 }
  0x21   : > { %2760 = shalt.err (!%p2757_p12)
}
  0x22   : > { %s2761_s28 = scalar_lea.vmem %s3095_s22, 1024  ;;  %p2769_p5 = scmp.lt.s32.totalorder %s3095_s22, %s3095_s22 }
  0x23   : > { %p2762_p13 = scmp.ne.s32.totalorder %s3095_s22, %s2761_s28  ;;  %p2770_p4 = scmp.lt.s32.totalorder %s2761_s28, %s2761_s28 }
  0x25   : > { %p2764_p0 = pnand %p2762_p13, %p3122_p8  ;;  %p2771_p7 = por %p2770_p4, %p2769_p5 }
  0x27   : > { %p2765_p2 = pneg %p2764_p0 }
  0x29   : > { %p2772_p9 = pnand %p2771_p7, %p2765_p2 }
  0x2b   : > { %2775 = shalt.err (!%p2772_p9)
}
  0x2c   : > { %s3654_s30 = smov 64   ;;  %s3002_s12 = smov 4  }
  0x2d   : > { %2618 = dma.hbm_to_vmem [thread:$0]  (!%p3106_p6), %s3662_s1, 1024, %s3095_s22, [#allocation6], %s3654_s30, %s3654_s30, %s3002_s12  }
  0x2e   : > { %s2776_s25 = scalar_lea.hbm %s3644_s5, 1024 }
  0x2f   : > { %p2777_p4 = scmp.ne.s32.totalorder %s3644_s5, %s2776_s25  ;;  %p2783_p12 = scmp.lt.u32.totalorder %s2776_s25, %s3644_s5 }
  0x31   : > { %p2779_p10 = pnand %p2777_p4, %p3122_p8 }
  0x33   : > { %p2780_p11 = pneg %p2779_p10 }
  0x35   : > { %p2785_p13 = pnand %p2783_p12, %p2780_p11 }
  0x37   : > { %2788 = shalt.err (!%p2785_p13)
}
  0x38   : > { %s2789_s22 = scalar_lea.vmem %s3110_s26, 1024  ;;  %p2797_p7 = scmp.lt.s32.totalorder %s3110_s26, %s3110_s26 }
  0x39   : > { %p2790_p0 = scmp.ne.s32.totalorder %s3110_s26, %s2789_s22  ;;  %p2798_p9 = scmp.lt.s32.totalorder %s2789_s22, %s2789_s22 }
  0x3b   : > { %p2792_p2 = pnand %p2790_p0, %p3122_p8  ;;  %p2799_p4 = por %p2798_p9, %p2797_p7 }
  0x3d   : > { %p2793_p5 = pneg %p2792_p2 }
  0x3f   : > { %p2800_p10 = pnand %p2799_p4, %p2793_p5 }
  0x41   : > { %2803 = shalt.err (!%p2800_p10)
}
  0x42   : > { %2624 = dma.hbm_to_vmem [thread:$0]  (!%p3106_p6), %s3644_s5, 1024, %s3110_s26, [#allocation9], %s3654_s30, %s3654_s30, %s3002_s12  }
  0x43   : > { %s2804_s14 = scalar_lea.hbm %s3642_s3, 1024 }
  0x44   : > { %p2805_p11 = scmp.ne.s32.totalorder %s3642_s3, %s2804_s14  ;;  %p2811_p0 = scmp.lt.u32.totalorder %s2804_s14, %s3642_s3 }
  0x46   : > { %p2807_p12 = pnand %p2805_p11, %p3122_p8 }
  0x48   : > { %p2808_p13 = pneg %p2807_p12 }
  0x4a   : > { %p2813_p2 = pnand %p2811_p0, %p2808_p13 }
  0x4c   : > { %2816 = shalt.err (!%p2813_p2)
}
  0x4d   : > { %s2817_s26 = scalar_lea.vmem %s3112_s29, 1024  ;;  %p2825_p4 = scmp.lt.s32.totalorder %s3112_s29, %s3112_s29 }
  0x4e   : > { %p2818_p5 = scmp.ne.s32.totalorder %s3112_s29, %s2817_s26  ;;  %p2826_p10 = scmp.lt.s32.totalorder %s2817_s26, %s2817_s26 }
  0x50   : > { %p2820_p7 = pnand %p2818_p5, %p3122_p8  ;;  %p2827_p11 = por %p2826_p10, %p2825_p4 }
  0x52   : > { %p2821_p9 = pneg %p2820_p7 }
  0x54   : > { %p2828_p12 = pnand %p2827_p11, %p2821_p9 }
  0x56   : > { %2831 = shalt.err (!%p2828_p12)
}
  0x57   : > { %2621 = dma.hbm_to_vmem [thread:$0]  (!%p3106_p6), %s3642_s3, 1024, %s3112_s29, [#allocation6], %s3654_s30, %s3654_s30, %s3002_s12  }
  0x58   : > { %s3003_s10 = smov [#allocation10]   ;;  %s3004_s13 = smov [#allocation11]  }
  0x59   : > { %s357_s11 = sshll.u32 %s3003_s10, 4  ;;  %s373_s14 = sshll.u32 %s3004_s13, 4  ;;  %s358_s11 = int_to_ptr.vmem [resolvable:$true] %s357_s11  ;;  %s374_s14 = int_to_ptr.vmem [resolvable:$true] %s373_s14 }
  0x5a   : > { %s2832_s25 = scalar_lea.hbm %s3646_s7, 1024 }
  0x5b   : > { %p2833_p13 = scmp.ne.s32.totalorder %s3646_s7, %s2832_s25  ;;  %p2839_p5 = scmp.lt.u32.totalorder %s2832_s25, %s3646_s7 }
  0x5d   : > { %p2835_p0 = pnand %p2833_p13, %p3122_p8 }
  0x5f   : > { %p2836_p2 = pneg %p2835_p0 }
  0x61   : > { %p2841_p7 = pnand %p2839_p5, %p2836_p2 }
  0x63   : > { %2844 = shalt.err (!%p2841_p7)
}
  0x64   : > { %s2845_s29 = scalar_lea.vmem %s358_s11, 1024  ;;  %p2853_p11 = scmp.lt.s32.totalorder %s358_s11, %s358_s11 }
  0x65   : > { %p2846_p9 = scmp.ne.s32.totalorder %s358_s11, %s2845_s29  ;;  %p2854_p12 = scmp.lt.s32.totalorder %s2845_s29, %s2845_s29 }
  0x67   : > { %p2848_p4 = pnand %p2846_p9, %p3122_p8  ;;  %p2855_p1 = por %p2854_p12, %p2853_p11 }
  0x69   : > { %p2849_p10 = pneg %p2848_p4 }
  0x6b   : > { %p2856_p3 = pnand %p2855_p1, %p2849_p10 }
  0x6d   : > { %2859 = shalt.err (!%p2856_p3)
}
  0x6e   : > { %2627 = dma.hbm_to_vmem [thread:$0]  (!%p3106_p6), %s3646_s7, 1024, %s358_s11, [#allocation9], %s3654_s30, %s3654_s30, %s3002_s12  }
  0x6f   : > { %s2860_s15 = scalar_lea.hbm %s3648_s9, 1024 }
  0x70   : > { %p2861_p1 = scmp.ne.s32.totalorder %s3648_s9, %s2860_s15  ;;  %p2867_p0 = scmp.lt.u32.totalorder %s2860_s15, %s3648_s9 }
  0x72   : > { %p2863_p3 = pnand %p2861_p1, %p3122_p8 }
  0x74   : > { %p2864_p13 = pneg %p2863_p3 }
  0x76   : > { %p2869_p2 = pnand %p2867_p0, %p2864_p13 }
  0x78   : > { %2872 = shalt.err (!%p2869_p2)
}
  0x79   : > { %s2873_s22 = scalar_lea.vmem %s374_s14, 1024  ;;  %p2881_p4 = scmp.lt.s32.totalorder %s374_s14, %s374_s14 }
  0x7a   : > { %p2874_p5 = scmp.ne.s32.totalorder %s374_s14, %s2873_s22  ;;  %p2882_p10 = scmp.lt.s32.totalorder %s2873_s22, %s2873_s22 }
  0x7c   : > { %p2876_p7 = pnand %p2874_p5, %p3122_p8  ;;  %p2883_p11 = por %p2882_p10, %p2881_p4 }
  0x7e   : > { %p2877_p9 = pneg %p2876_p7 }
  0x80   : > { %p2884_p12 = pnand %p2883_p11, %p2877_p9 }
  0x82   : > { %2887 = shalt.err (!%p2884_p12)
}
  0x83   : > { %2630 = dma.hbm_to_vmem [thread:$0]  (!%p3106_p6), %s3648_s9, 1024, %s374_s14, [#allocation12], %s3654_s30, %s3654_s30, %s3002_s12  }
  0x84   : > { %s2128_s27 = sadd.s32 4294967294, %s2996_s20   ;;  %s3242_s16 = sadd.s32 1, %s2996_s20  }
  0x85   : > { %s37_s1 = sadd.s32 1, %s2992_s19  ;;  %s34_s8 = ssub.s32 %s2996_s20, %s3242_s16 }
  0x86   : > { %p44_p8 = scmp.ne.s32.totalorder %s2992_s19, %s2988_s18  ;;  %p35_p1 = scmp.eq.s32.totalorder %s34_s8, 0 }
  0x87   : > { %p45_p3 = scmp.eq.s32.totalorder %s2996_s20, 0  ;;  %p50_p13 = scmp.ne.s32.totalorder %s2988_s18, %s2984_s17 }
  0x88   : > { %p284_p0 = scmp.eq.s32.totalorder %s3090_s23, 1  ;;  %p3664_p5 = scmp.eq.s32.totalorder %s3090_s23, 0 }
  0x89   : > { %s3254_s10 = scalar_select %p35_p1, %s2992_s19, %s37_s1  }
  0x8a   : > { %p46_p2 = por %p45_p3, %p44_p8  ;;  %p3258_p7 = por %p3664_p5, %p50_p13 }
  0x8b   : > { %p3262_p6 = por %p284_p0, %p44_p8  ;;  %p290_p9 = scmp.eq.s32.totalorder %s2128_s27, 1 }
  0x8c   : > { %p2644_p4 = scmp.lt.s32.totalorder %s2996_s20, 2  ;;  %s390_s15 = sand.u32 1, %s2992_s19  }
  0x8d   : > { %s3666_s14 = scalar_select %p3262_p6, 1, 0 }
  0x8e   : > { %p3268_p10 = por %p290_p9, %p50_p13  ;;  %s2136_s25 = sshll.u32 %s390_s15, 7 }
  0x8f   : > { %s2213_s28 = sshll.u32 %s2996_s20, 11  ;;  %s394_s29 = scalar_lea.vmem [#allocation2], %s2136_s25 }
  0x90   : > { %s3667_s21 = scalar_select %p3268_p10, 1, 0 }
  0x91   : > { %s3276_s11 = scalar_lea.hbm %s3639_s0, %s2213_s28  ;;  %s401_s1 = sshll.u32 %s394_s29, 4  ;;  %s3282_s1 = int_to_ptr.vmem [resolvable:$true] %s401_s1 }
  0x92   : > { %p3278_p11 = pnand %p2644_p4, %p46_p2  ;;  %s3284_s8 = scalar_lea.sflag [#allocation3], %s390_s15 }
  0x93   : > { %s2888_s30 = scalar_lea.hbm %s3276_s11, 2048  ;;  %s2893_s26 = scalar_lea.hbm %s3639_s0, 4096 }
  0x94   : > { %p2889_p12 = scmp.ne.s32.totalorder %s3276_s11, %s2888_s30  ;;  %p2890_p8 = pneg %p3278_p11 }
  0x95   : > { %p2894_p13 = scmp.lt.u32.totalorder %s3276_s11, %s3639_s0  ;;  %p2895_p0 = scmp.lt.u32.totalorder %s2893_s26, %s2888_s30 }
  0x96   : > { %p2891_p1 = pnand %p2890_p8, %p2889_p12  ;;  %p2897_p5 = scmp.lt.u32.totalorder %s2888_s30, %s3276_s11 }
  0x97   : > { %p2896_p2 = por %p2895_p0, %p2894_p13 }
  0x98   : > { %p2892_p3 = pneg %p2891_p1 }
  0x99   : > { %p2898_p9 = por %p2897_p5, %p2896_p2 }
  0x9b   : > { %p2899_p4 = pnand %p2898_p9, %p2892_p3 }
  0x9d   : > { %2902 = shalt.err (!%p2899_p4)
}
  0x9e   : > { %s2903_s15 = scalar_lea.vmem %s3282_s1, 2048  ;;  %s3005_s25 = smov [#allocation2]  }
  0x9f   : > { %p2904_p12 = scmp.ne.s32.totalorder %s3282_s1, %s2903_s15  ;;  %s2908_s28 = sshll.u32 %s3005_s25, 4  ;;  %s2909_s28 = int_to_ptr.vmem [resolvable:$false] %s2908_s28 }
  0xa0   : > { %s2910_s22 = scalar_lea.vmem %s2909_s28, 4096  ;;  %p2911_p6 = scmp.lt.s32.totalorder %s3282_s1, %s2909_s28 }
  0xa1   : > { %p2906_p1 = pnand %p2904_p12, %p2890_p8  ;;  %p2912_p13 = scmp.lt.s32.totalorder %s2910_s22, %s2903_s15 }
  0xa3   : > { %p2907_p10 = pneg %p2906_p1  ;;  %p2913_p0 = por %p2912_p13, %p2911_p6 }
  0xa5   : > { %p2914_p2 = pnand %p2913_p0, %p2907_p10 }
  0xa7   : > { %2917 = shalt.err (!%p2914_p2)
}
  0xa8   : > { %s3669_s30 = smov 64   ;;  %p3670_p8 = scmp.ne.s32.totalorder %s3660_s24, 0 }
  0xa9   : > { %2634 = dma.hbm_to_vmem [thread:$0]  (!%p3278_p11), %s3276_s11, 2048, %s3282_s1, %s3284_s8, %s3669_s30, %s3669_s30, %s3002_s12  }
  0xaa   : > { %413 = sbr.rel (%p3670_p8) target bundleno = 1397 (0x575), region = 64  ;;  %s3318_s26 = sand.u32 (!%p3670_p8), 1, %s2988_s18  }
  0xab   : > { %s2140_s29 = sshll.u32 (!%p3670_p8), %s3318_s26, 7  ;;  %s416_s15 = scalar_lea.sflag (!%p3670_p8), [#allocation3], %s3318_s26 }
  0xac   : > { %s3322_s25 = scalar_lea.vmem (!%p3670_p8), [#allocation2], %s2140_s29 }
  0xb1   : > { %2963 = dma.done.wait (%p3258_p7), %s416_s15, 2048  }
  0xb2   : > { %2965 = vsyncadd (%p3258_p7), %s416_s15, 4294965248  ;;  %p3671_p6 = scmp.eq.s32.totalorder %s3090_s23, 0 }
  0xb4   : > { %2967 = dma.done.wait (%p3671_p6), [#allocation6], 2048   ;;  %p3672_p10 = pmov %p3671_p6 }
  0xb5   : > { %p3673_p11 = pmov %p3671_p6 }
  0xb6   : > { %2969 = vsyncadd (%p3672_p10), [#allocation6], 4294965248 }
  0xb7   : > { %2971 = dma.done.wait (%p3673_p11), [#allocation9], 2048   ;;  %p3674_p3 = pmov %p3671_p6 }
  0xb9   : > { %2973 = vsyncadd (%p3674_p3), [#allocation9], 4294965248  ;;  %p3675_p5 = pmov %p3674_p3 }
  0xba   : > { %p3676_p9 = pmov %p3674_p3 }
  0xbb   : > { %2975 = dma.done.wait (%p3675_p5), [#allocation12], 1024  }
  0xbc   : > { %2977 = vsyncadd (%p3676_p9), [#allocation12], 4294966272  ;;  %v2692_v0 = vld [vmem:[#allocation5] sm:$0xff]   ;;  %v2693_v1 = vld [vmem:[#allocation5 + $0x8] sm:$0xff]   ;;  %s3677_s22 = sld [smem:[#allocation20_spill]]  ;;  %s2146_s30 = sshll.u32 %s3318_s26, 8 }
  0xbd   : > { %2335 = vmatprep.subr.bf16.mxu0 %v2692_v0  ;;  %2575 = vmatprep.subr.bf16.mxu1 %v2692_v0  ;;  %v2694_v2 = vld [vmem:[#allocation5 + $0x10] sm:$0xff]   ;;  %v2695_v3 = vld [vmem:[#allocation5 + $0x18] sm:$0xff]   ;;  %v2700_v4 = vld [vmem:[%s3322_s25] sm:$0xff]   ;;  %s3524_s24 = scalar_lea.vmem [#allocation13], %s2146_s30  ;;  %s2214_s12 = sshll.u32 %s3090_s23, 12 }
  0xbe   : > { %2336 = vmatpush3.bf16.msra.mxu0 %v2692_v0  ;;  %2583 = vmatpush3.bf16.msra.mxu1 %v2692_v0  ;;  %v2696_v5 = vld [vmem:[#allocation5 + $0x20] sm:$0xff]   ;;  %v2697_v6 = vld [vmem:[#allocation5 + $0x28] sm:$0xff]   ;;  %v2698_v8 = vld [vmem:[#allocation5 + $0x30] sm:$0xff]   ;;  %s2007_s13 = sshll.u32 %s3524_s24, 4  ;;  %s3679_s27 = sld [smem:[#allocation22_spill]]  ;;  %s3591_s13 = int_to_ptr.vmem [resolvable:$true] %s2007_s13 }
  0xbf   : > { %2337 = vmatprep.subr.bf16.mxu0 %v2693_v1  ;;  %2576 = vmatprep.subr.bf16.mxu1 %v2693_v1  ;;  %v2708_v7 = vld [vmem:[%s3322_s25 + $0x40] sm:$0xff]   ;;  %v2699_v9 = vld [vmem:[#allocation5 + $0x38] sm:$0xff]   ;;  %v2701_v10 = vld [vmem:[%s3322_s25 + $0x8] sm:$0xff]   ;;  %s1994_s23 = scalar_lea.sflag [#allocation4], %s3318_s26  ;;  %s2918_s28 = scalar_lea.vmem %s3591_s13, 4096 }
  0xc0   : > { %2351 = vmatprep.mubr.bf16.mxu0 %v2700_v4  ;;  %2367 = vmatprep.mubr.bf16.mxu1 %v2708_v7  ;;  %v2709_v11 = vld [vmem:[%s3322_s25 + $0x48] sm:$0xff]   ;;  %v2716_v12 = vld [vmem:[#allocation7] sm:$0xff]   ;;  %v2702_v13 = vld [vmem:[%s3322_s25 + $0x10] sm:$0xff]   ;;  %p2919_p7 = scmp.ne.s32.totalorder %s3591_s13, %s2918_s28  ;;  %p3680_p4 = scmp.ne.s32.totalorder %s3666_s14, 0 }
  0xc1   : > { %v2710_v14 = vld [vmem:[%s3322_s25 + $0x50] sm:$0xff]   ;;  %v2717_v15 = vld [vmem:[#allocation7 + $0x8] sm:$0xff]   ;;  %v2703_v17 = vld [vmem:[%s3322_s25 + $0x18] sm:$0xff]  }
  0xc2   : > { %2338 = vmatpush3.bf16.msra.mxu0 %v2693_v1  ;;  %2584 = vmatpush3.bf16.msra.mxu1 %v2693_v1  ;;  %v2718_v16 = vld [vmem:[#allocation7 + $0x10] sm:$0xff]   ;;  %v2711_v18 = vld [vmem:[%s3322_s25 + $0x58] sm:$0xff]   ;;  %v2704_v19 = vld [vmem:[%s3322_s25 + $0x20] sm:$0xff]   ;;  %p2920_p12 = pnand %p2919_p7, %p3680_p4 }
  0xc3   : > { %2339 = vmatprep.subr.bf16.mxu0 %v2694_v2  ;;  %2577 = vmatprep.subr.bf16.mxu1 %v2694_v2  ;;  %v2712_v20 = vld [vmem:[%s3322_s25 + $0x60] sm:$0xff]   ;;  %v2719_v21 = vld [vmem:[#allocation7 + $0x18] sm:$0xff]   ;;  %v2705_v23 = vld [vmem:[%s3322_s25 + $0x28] sm:$0xff]  }
  0xc4   : > { %v2720_v22 = vld [vmem:[#allocation7 + $0x20] sm:$0xff]   ;;  %v2713_v24 = vld [vmem:[%s3322_s25 + $0x68] sm:$0xff]   ;;  %v2706_v25 = vld [vmem:[%s3322_s25 + $0x30] sm:$0xff]   ;;  %s3589_s8 = scalar_lea.hbm %s3679_s27, %s2214_s12  ;;  %p2921_p1 = pneg %p2920_p12 }
  0xc5   : > { %v2714_v26 = vld [vmem:[%s3322_s25 + $0x70] sm:$0xff]   ;;  %v2721_v27 = vld [vmem:[#allocation7 + $0x28] sm:$0xff]   ;;  %v2707_v28 = vld [vmem:[%s3322_s25 + $0x38] sm:$0xff]  }
  0xc6   : > { %2340 = vmatpush3.bf16.msra.mxu0 %v2694_v2  ;;  %2585 = vmatpush3.bf16.msra.mxu1 %v2694_v2  ;;  %v2715_v29 = vld [vmem:[%s3322_s25 + $0x78] sm:$0xff]   ;;  %v2722_v30 = vld [vmem:[#allocation7 + $0x30] sm:$0xff]   ;;  %v2724_v32 = vld [vmem:[#allocation8] sm:$0xff]   ;;  %s3678_s25 = sld [smem:[#allocation21_spill]] }
  0xc7   : > { %2341 = vmatprep.subr.bf16.mxu0 %v2695_v3  ;;  %2578 = vmatprep.subr.bf16.mxu1 %v2695_v3  ;;  %v2723_v31 = vld [vmem:[#allocation7 + $0x38] sm:$0xff]   ;;  %v2725_v33 = vld [vmem:[#allocation8 + $0x8] sm:$0xff]   ;;  %v2726_v34 = vld [vmem:[#allocation8 + $0x10] sm:$0xff]  }
  0xc8   : > { %v2727_v35 = vld [vmem:[#allocation8 + $0x18] sm:$0xff]   ;;  %v2728_v36 = vld [vmem:[#allocation8 + $0x20] sm:$0xff]   ;;  %v2729_v37 = vld [vmem:[#allocation8 + $0x28] sm:$0xff]  }
  0xc9   : > { %v3359_v38 = vld [vmem:[%s3641_s2] ss:$0 sm:$0xff] }
  0xca   : > { %2342 = vmatpush3.bf16.msra.mxu0 %v2695_v3  ;;  %2586 = vmatpush3.bf16.msra.mxu1 %v2695_v3 }
  0xcb   : > { %2343 = vmatprep.subr.bf16.mxu0 %v2696_v5  ;;  %2579 = vmatprep.subr.bf16.mxu1 %v2696_v5 }
  0xce   : > { %2344 = vmatpush3.bf16.msra.mxu0 %v2696_v5  ;;  %2587 = vmatpush3.bf16.msra.mxu1 %v2696_v5 }
  0xcf   : > { %2345 = vmatprep.subr.bf16.mxu0 %v2697_v6  ;;  %2580 = vmatprep.subr.bf16.mxu1 %v2697_v6 }
  0xd2   : > { %2346 = vmatpush3.bf16.msra.mxu0 %v2697_v6  ;;  %2588 = vmatpush3.bf16.msra.mxu1 %v2697_v6 }
  0xd3   : > { %2347 = vmatprep.subr.bf16.mxu0 %v2698_v8  ;;  %2581 = vmatprep.subr.bf16.mxu1 %v2698_v8 }
  0xd6   : > { %2348 = vmatpush3.bf16.msra.mxu0 %v2698_v8  ;;  %2589 = vmatpush3.bf16.msra.mxu1 %v2698_v8 }
  0xd7   : > { %2349 = vmatprep.subr.bf16.mxu0 %v2699_v9  ;;  %2582 = vmatprep.subr.bf16.mxu1 %v2699_v9 }
  0xda   : > { %2350 = vmatpush3.bf16.msra.mxu0 %v2699_v9  ;;  %2590 = vmatpush3.bf16.msra.mxu1 %v2699_v9 }
  0xdb   : > { %2383 = vmatprep.subr.bf16.mxu1 %v2716_v12  ;;  %2431 = vmatprep.subr.bf16.mxu0 %v2724_v32 }
  0xdd   : > { %2352 = vmatmul.mubr.bf16.vlgmr.msra.gmra.mrb[0].mxu0 %v2701_v10  ;;  %2368 = vmatmul.mubr.bf16.vlgmr.msra.gmra.mrb[0].mxu1 %v2709_v11 }
  0xde   : > { %2355 = vmatprep.mubr.bf16.mxu0 %v2702_v13  ;;  %2371 = vmatprep.mubr.bf16.mxu1 %v2710_v14 }
  0xdf   : > { %2384 = vmatpush3.bf16.msra.mxu1 %v2716_v12  ;;  %2432 = vmatpush3.bf16.msra.mxu0 %v2724_v32 }
  0xe0   : > { %2385 = vmatprep.subr.bf16.mxu1 %v2717_v15  ;;  %2433 = vmatprep.subr.bf16.mxu0 %v2725_v33 }
  0xe3   : > { %2386 = vmatpush3.bf16.msra.mxu1 %v2717_v15  ;;  %2434 = vmatpush3.bf16.msra.mxu0 %v2725_v33 }
  0xe4   : > { %2387 = vmatprep.subr.bf16.mxu1 %v2718_v16  ;;  %2435 = vmatprep.subr.bf16.mxu0 %v2726_v34 }
  0xe5   : > { %2356 = vmatmul.mubr.bf16.gmra.mrb[4].mxu0 %v2703_v17  ;;  %2372 = vmatmul.mubr.bf16.gmra.mrb[4].mxu1 %v2711_v18 }
  0xe6   : > { %2359 = vmatprep.mubr.bf16.mxu0 %v2704_v19  ;;  %2375 = vmatprep.mubr.bf16.mxu1 %v2712_v20 }
  0xe7   : > { %2388 = vmatpush3.bf16.msra.mxu1 %v2718_v16  ;;  %2436 = vmatpush3.bf16.msra.mxu0 %v2726_v34 }
  0xe8   : > { %2389 = vmatprep.subr.bf16.mxu1 %v2719_v21  ;;  %2437 = vmatprep.subr.bf16.mxu0 %v2727_v35 }
  0xeb   : > { %2390 = vmatpush3.bf16.msra.mxu1 %v2719_v21  ;;  %2438 = vmatpush3.bf16.msra.mxu0 %v2727_v35 }
  0xec   : > { %2391 = vmatprep.subr.bf16.mxu1 %v2720_v22  ;;  %2439 = vmatprep.subr.bf16.mxu0 %v2728_v36 }
  0xed   : > { %2360 = vmatmul.mubr.bf16.gmra.mrb[8].mxu0 %v2705_v23  ;;  %2376 = vmatmul.mubr.bf16.gmra.mrb[8].mxu1 %v2713_v24 }
  0xee   : > { %2363 = vmatprep.mubr.bf16.mxu0 %v2706_v25  ;;  %2379 = vmatprep.mubr.bf16.mxu1 %v2714_v26 }
  0xef   : > { %2392 = vmatpush3.bf16.msra.mxu1 %v2720_v22  ;;  %2440 = vmatpush3.bf16.msra.mxu0 %v2728_v36 }
  0xf0   : > { %2393 = vmatprep.subr.bf16.mxu1 %v2721_v27  ;;  %2441 = vmatprep.subr.bf16.mxu0 %v2729_v37 }
  0xf3   : > { %2394 = vmatpush3.bf16.msra.mxu1 %v2721_v27  ;;  %2442 = vmatpush3.bf16.msra.mxu0 %v2729_v37 }
  0xf4   : > { %2395 = vmatprep.subr.bf16.mxu1 %v2722_v30 }
  0xf5   : > { %2364 = vmatmul.mubr.bf16.gmra.mrb[12].mxu0 %v2707_v28  ;;  %2380 = vmatmul.mubr.bf16.gmra.mrb[12].mxu1 %v2715_v29 }
  0xf7   : > { %2396 = vmatpush3.bf16.msra.mxu1 %v2722_v30 }
  0xf8   : > { %2397 = vmatprep.subr.bf16.mxu1 %v2723_v31 }
  0xfb   : > { %2398 = vmatpush3.bf16.msra.mxu1 %v2723_v31 }
 0x1b0   : > { %v2353_v39 = vpop.f32.mrb[0].mxu0  ;;  %v2369_v40 = vpop.f32.mrb[0].mxu1 }
 0x1b1   : > { %v723_v41 = vadd.f32 %v2353_v39, %v3359_v38  ;;  %v714_v42 = vpop.f32.mrb[1].mxu0  ;;  %v787_v43 = vadd.f32 %v2369_v40, %v3359_v38  ;;  %v778_v44 = vpop.f32.mrb[1].mxu1 }
 0x1b2   : > { %v715_v45 = vadd.f32 %v3359_v38, %v714_v42  ;;  %v2354_v46 = vpop.f32.mrb[2].mxu0  ;;  %v779_v47 = vadd.f32 %v3359_v38, %v778_v44  ;;  %v2370_v48 = vpop.f32.mrb[2].mxu1 }
 0x1b3   : > { %v726_v49 = vadd.f32 %v2354_v46, %v3359_v38  ;;  %v717_v50 = vpop.f32.mrb[3].mxu0  ;;  %v859_v51 = vmax.f32 %v787_v43, 0.0  ;;  %v790_v52 = vadd.f32 %v2370_v48, %v3359_v38  ;;  %v781_v53 = vpop.f32.mrb[3].mxu1  ;;  %v843_v57 = vmax.f32 %v723_v41, 0.0 }
 0x1b4   : > { %v718_v54 = vadd.f32 %v3359_v38, %v717_v50  ;;  %v857_v55 = vmax.f32 %v779_v47, 0.0  ;;  %v782_v56 = vadd.f32 %v3359_v38, %v781_v53  ;;  %v841_v60 = vmax.f32 %v715_v45, 0.0 }
 0x1b5   : > { %v844_v58 = vmax.f32 %v726_v49, 0.0  ;;  %v860_v59 = vmax.f32 %v790_v52, 0.0 }
 0x1b6   : > { %v842_v61 = vmax.f32 %v718_v54, 0.0  ;;  %v858_v62 = vmax.f32 %v782_v56, 0.0 }
 0x1b7   : > { %v874_v63 = vpack.c.bf16 %v844_v58, %v843_v57  ;;  %v3369_v0 = vpack.c.bf16 %v860_v59, %v859_v51 }
 0x1b8   : > { %v873_v1 = vpack.c.bf16 %v842_v61, %v841_v60  ;;  %v2357_v2 = vpop.f32.mrb[4].mxu0  ;;  %v3371_v3 = vpack.c.bf16 %v858_v62, %v857_v55  ;;  %v2373_v4 = vpop.f32.mrb[4].mxu1 }
 0x1b9   : > { %v739_v5 = vadd.f32 %v2357_v2, %v3359_v38  ;;  %v730_v6 = vpop.f32.mrb[5].mxu0  ;;  %v803_v7 = vadd.f32 %v2373_v4, %v3359_v38  ;;  %v794_v8 = vpop.f32.mrb[5].mxu1 }
 0x1ba   : > { %v731_v9 = vadd.f32 %v3359_v38, %v730_v6  ;;  %v2358_v10 = vpop.f32.mrb[6].mxu0  ;;  %2399 = vmatprep.mubr.bf16.mxu1 %v873_v1  ;;  %v795_v11 = vadd.f32 %v3359_v38, %v794_v8  ;;  %v2374_v12 = vpop.f32.mrb[6].mxu1 }
 0x1bb   : > { %v742_v13 = vadd.f32 %v2358_v10, %v3359_v38  ;;  %v733_v14 = vpop.f32.mrb[7].mxu0  ;;  %2400 = vmatmul.mubr.bf16.vlgmr.msra.gmra.mrb[16].mxu1 %v874_v63  ;;  %v863_v15 = vmax.f32 %v803_v7, 0.0  ;;  %v806_v16 = vadd.f32 %v2374_v12, %v3359_v38  ;;  %v797_v17 = vpop.f32.mrb[7].mxu1  ;;  %v847_v21 = vmax.f32 %v739_v5, 0.0 }
 0x1bc   : > { %v734_v18 = vadd.f32 %v3359_v38, %v733_v14  ;;  %v861_v19 = vmax.f32 %v795_v11, 0.0  ;;  %v798_v20 = vadd.f32 %v3359_v38, %v797_v17  ;;  %v845_v24 = vmax.f32 %v731_v9, 0.0 }
 0x1bd   : > { %v848_v22 = vmax.f32 %v742_v13, 0.0  ;;  %v864_v23 = vmax.f32 %v806_v16, 0.0 }
 0x1be   : > { %v846_v25 = vmax.f32 %v734_v18, 0.0  ;;  %v862_v26 = vmax.f32 %v798_v20, 0.0 }
 0x1bf   : > { %v876_v27 = vpack.c.bf16 %v848_v22, %v847_v21  ;;  %v3381_v28 = vpack.c.bf16 %v864_v23, %v863_v15 }
 0x1c0   : > { %v875_v29 = vpack.c.bf16 %v846_v25, %v845_v24  ;;  %v2361_v30 = vpop.f32.mrb[8].mxu0  ;;  %v3383_v31 = vpack.c.bf16 %v862_v26, %v861_v19  ;;  %v2377_v32 = vpop.f32.mrb[8].mxu1  ;;  %v2731_v26 = vld [vmem:[#allocation8 + $0x38] sm:$0xff]  }
 0x1c1   : > { %v755_v33 = vadd.f32 %v2361_v30, %v3359_v38  ;;  %v746_v34 = vpop.f32.mrb[9].mxu0  ;;  %v819_v35 = vadd.f32 %v2377_v32, %v3359_v38  ;;  %v810_v36 = vpop.f32.mrb[9].mxu1  ;;  %v2737_v30 = vld [vmem:[#allocation10 + $0x28] sm:$0xff]   ;;  %v3408_v32 = vld [vmem:[%s3643_s4] ss:$0 sm:$0xff] }
 0x1c2   : > { %v747_v37 = vadd.f32 %v3359_v38, %v746_v34  ;;  %v2362_v39 = vpop.f32.mrb[10].mxu0  ;;  %2403 = vmatprep.mubr.bf16.mxu1 %v875_v29  ;;  %v811_v40 = vadd.f32 %v3359_v38, %v810_v36  ;;  %v2378_v41 = vpop.f32.mrb[10].mxu1  ;;  %v2733_v29 = vld [vmem:[#allocation10 + $0x8] sm:$0xff]  }
 0x1c3   : > { %v758_v42 = vadd.f32 %v2362_v39, %v3359_v38  ;;  %v749_v43 = vpop.f32.mrb[11].mxu0  ;;  %2404 = vmatmul.mubr.bf16.gmra.mrb[20].mxu1 %v876_v27  ;;  %v867_v44 = vmax.f32 %v819_v35, 0.0  ;;  %v822_v45 = vadd.f32 %v2378_v41, %v3359_v38  ;;  %v813_v46 = vpop.f32.mrb[11].mxu1  ;;  %v851_v50 = vmax.f32 %v755_v33, 0.0  ;;  %v2732_v27 = vld [vmem:[#allocation10] sm:$0xff]  }
 0x1c4   : > { %v750_v47 = vadd.f32 %v3359_v38, %v749_v43  ;;  %v865_v48 = vmax.f32 %v811_v40, 0.0  ;;  %v814_v49 = vadd.f32 %v3359_v38, %v813_v46  ;;  %v849_v53 = vmax.f32 %v747_v37, 0.0  ;;  %2479 = vmatprep.subr.bf16.mxu1 %v2732_v27 }
 0x1c5   : > { %v852_v51 = vmax.f32 %v758_v42, 0.0  ;;  %v868_v52 = vmax.f32 %v822_v45, 0.0  ;;  %2480 = vmatpush3.bf16.msra.mxu1 %v2732_v27 }
 0x1c6   : > { %v850_v54 = vmax.f32 %v750_v47, 0.0  ;;  %v866_v55 = vmax.f32 %v814_v49, 0.0  ;;  %2481 = vmatprep.subr.bf16.mxu1 %v2733_v29 }
 0x1c7   : > { %v878_v56 = vpack.c.bf16 %v852_v51, %v851_v50  ;;  %v886_v57 = vpack.c.bf16 %v868_v52, %v867_v44 }
 0x1c8   : > { %v877_v58 = vpack.c.bf16 %v850_v54, %v849_v53  ;;  %v2365_v59 = vpop.f32.mrb[12].mxu0  ;;  %v885_v60 = vpack.c.bf16 %v866_v55, %v865_v48  ;;  %v2381_v61 = vpop.f32.mrb[12].mxu1 }
 0x1c9   : > { %v771_v62 = vadd.f32 %v2365_v59, %v3359_v38  ;;  %v762_v63 = vpop.f32.mrb[13].mxu0  ;;  %v835_v1 = vadd.f32 %v2381_v61, %v3359_v38  ;;  %v826_v2 = vpop.f32.mrb[13].mxu1  ;;  %2482 = vmatpush3.bf16.msra.mxu1 %v2733_v29 }
 0x1ca   : > { %v763_v4 = vadd.f32 %v3359_v38, %v762_v63  ;;  %v2366_v5 = vpop.f32.mrb[14].mxu0  ;;  %2407 = vmatprep.mubr.bf16.mxu1 %v877_v58  ;;  %v827_v6 = vadd.f32 %v3359_v38, %v826_v2  ;;  %v2382_v7 = vpop.f32.mrb[14].mxu1 }
 0x1cb   : > { %v774_v8 = vadd.f32 %v2366_v5, %v3359_v38  ;;  %v765_v9 = vpop.f32.mrb[15].mxu0  ;;  %2408 = vmatmul.mubr.bf16.gmra.mrb[24].mxu1 %v878_v56  ;;  %v871_v10 = vmax.f32 %v835_v1, 0.0  ;;  %v838_v11 = vadd.f32 %v2382_v7, %v3359_v38  ;;  %v829_v12 = vpop.f32.mrb[15].mxu1  ;;  %v855_v16 = vmax.f32 %v771_v62, 0.0 }
 0x1cc   : > { %v766_v13 = vadd.f32 %v3359_v38, %v765_v9  ;;  %v869_v14 = vmax.f32 %v827_v6, 0.0  ;;  %v830_v15 = vadd.f32 %v3359_v38, %v829_v12  ;;  %v853_v19 = vmax.f32 %v763_v4, 0.0  ;;  %v2730_v38 = vld [vmem:[#allocation8 + $0x30] sm:$0xff]  }
 0x1cd   : > { %v856_v17 = vmax.f32 %v774_v8, 0.0  ;;  %v872_v18 = vmax.f32 %v838_v11, 0.0  ;;  %2443 = vmatprep.subr.bf16.mxu0 %v2730_v38 }
 0x1ce   : > { %v854_v20 = vmax.f32 %v766_v13, 0.0  ;;  %v870_v21 = vmax.f32 %v830_v15, 0.0  ;;  %2444 = vmatpush3.bf16.msra.mxu0 %v2730_v38 }
 0x1cf   : > { %v880_v22 = vpack.c.bf16 %v856_v17, %v855_v16  ;;  %v888_v23 = vpack.c.bf16 %v872_v18, %v871_v10  ;;  %2445 = vmatprep.subr.bf16.mxu0 %v2731_v26 }
 0x1d0   : > { %v879_v24 = vpack.c.bf16 %v854_v20, %v853_v19  ;;  %v887_v25 = vpack.c.bf16 %v870_v21, %v869_v14 }
 0x1d2   : > { %2411 = vmatprep.mubr.bf16.mxu1 %v879_v24  ;;  %2446 = vmatpush3.bf16.msra.mxu0 %v2731_v26 }
 0x1d3   : > { %2412 = vmatmul.mubr.bf16.gmra.mrb[28].mxu1 %v880_v22 }
 0x1d4   : > { %2415 = vmatprep.mubr.bf16.mxu1 %v3371_v3  ;;  %v2735_v3 = vld [vmem:[#allocation10 + $0x18] sm:$0xff]  }
 0x1db   : > { %2416 = vmatmul.mubr.bf16.gmra.mrb[32].mxu1 %v3369_v0  ;;  %v2734_v0 = vld [vmem:[#allocation10 + $0x10] sm:$0xff]  }
 0x1dc   : > { %2419 = vmatprep.mubr.bf16.mxu1 %v3383_v31  ;;  %2483 = vmatprep.subr.bf16.mxu1 %v2734_v0  ;;  %v2738_v31 = vld [vmem:[#allocation10 + $0x30] sm:$0xff]  }
 0x1dd   : > { %2484 = vmatpush3.bf16.msra.mxu1 %v2734_v0 }
 0x1de   : > { %2485 = vmatprep.subr.bf16.mxu1 %v2735_v3 }
 0x1e1   : > { %2486 = vmatpush3.bf16.msra.mxu1 %v2735_v3 }
 0x1e3   : > { %2420 = vmatmul.mubr.bf16.gmra.mrb[36].mxu1 %v3381_v28  ;;  %v2736_v28 = vld [vmem:[#allocation10 + $0x20] sm:$0xff]  }
 0x1e4   : > { %2423 = vmatprep.mubr.bf16.mxu1 %v885_v60  ;;  %2487 = vmatprep.subr.bf16.mxu1 %v2736_v28 }
 0x1e5   : > { %2488 = vmatpush3.bf16.msra.mxu1 %v2736_v28 }
 0x1e6   : > { %2489 = vmatprep.subr.bf16.mxu1 %v2737_v30 }
 0x1e9   : > { %2490 = vmatpush3.bf16.msra.mxu1 %v2737_v30 }
 0x1ea   : > { %2491 = vmatprep.subr.bf16.mxu1 %v2738_v31 }
 0x1eb   : > { %2424 = vmatmul.mubr.bf16.gmra.mrb[40].mxu1 %v886_v57 }
 0x1ec   : > { %2427 = vmatprep.mubr.bf16.mxu1 %v887_v25 }
 0x1ed   : > { %2492 = vmatpush3.bf16.msra.mxu1 %v2738_v31 }
 0x1f3   : > { %2428 = vmatmul.mubr.bf16.gmra.mrb[44].mxu1 %v888_v23 }
 0x28e   : > { %v2401_v33 = vpop.f32.mrb[16].mxu1 }
 0x28f   : > { %v1003_v34 = vadd.f32 %v2401_v33, %v3408_v32  ;;  %v994_v35 = vpop.f32.mrb[17].mxu1 }
 0x290   : > { %v995_v36 = vadd.f32 %v3408_v32, %v994_v35  ;;  %v2402_v37 = vpop.f32.mrb[18].mxu1 }
 0x291   : > { %v1006_v39 = vadd.f32 %v2402_v37, %v3408_v32  ;;  %v997_v40 = vpop.f32.mrb[19].mxu1  ;;  %v1123_v42 = vmax.f32 %v1003_v34, 0.0 }
 0x292   : > { %v998_v41 = vadd.f32 %v3408_v32, %v997_v40  ;;  %v1121_v44 = vmax.f32 %v995_v36, 0.0 }
 0x293   : > { %v1124_v43 = vmax.f32 %v1006_v39, 0.0 }
 0x294   : > { %v1122_v45 = vmax.f32 %v998_v41, 0.0 }
 0x295   : > { %v1154_v46 = vpack.c.bf16 %v1124_v43, %v1123_v42 }
 0x296   : > { %v1153_v47 = vpack.c.bf16 %v1122_v45, %v1121_v44  ;;  %v2405_v48 = vpop.f32.mrb[20].mxu1 }
 0x297   : > { %v1019_v49 = vadd.f32 %v2405_v48, %v3408_v32  ;;  %v1010_v50 = vpop.f32.mrb[21].mxu1 }
 0x298   : > { %v1011_v51 = vadd.f32 %v3408_v32, %v1010_v50  ;;  %v2406_v52 = vpop.f32.mrb[22].mxu1  ;;  %2447 = vmatprep.mubr.bf16.mxu0 %v1153_v47 }
 0x299   : > { %v1022_v53 = vadd.f32 %v2406_v52, %v3408_v32  ;;  %v1013_v54 = vpop.f32.mrb[23].mxu1  ;;  %2448 = vmatmul.mubr.bf16.vlgmr.msra.gmra.mrb[16].mxu0 %v1154_v46  ;;  %v1127_v56 = vmax.f32 %v1019_v49, 0.0 }
 0x29a   : > { %v1014_v55 = vadd.f32 %v3408_v32, %v1013_v54  ;;  %v1125_v58 = vmax.f32 %v1011_v51, 0.0 }
 0x29b   : > { %v1128_v57 = vmax.f32 %v1022_v53, 0.0 }
 0x29c   : > { %v1126_v59 = vmax.f32 %v1014_v55, 0.0 }
 0x29d   : > { %v1156_v60 = vpack.c.bf16 %v1128_v57, %v1127_v56 }
 0x29e   : > { %v1155_v61 = vpack.c.bf16 %v1126_v59, %v1125_v58  ;;  %v2409_v62 = vpop.f32.mrb[24].mxu1 }
 0x29f   : > { %v1035_v63 = vadd.f32 %v2409_v62, %v3408_v32  ;;  %v1026_v1 = vpop.f32.mrb[25].mxu1 }
 0x2a0   : > { %v1027_v2 = vadd.f32 %v3408_v32, %v1026_v1  ;;  %v2410_v4 = vpop.f32.mrb[26].mxu1  ;;  %2451 = vmatprep.mubr.bf16.mxu0 %v1155_v61 }
 0x2a1   : > { %v1038_v5 = vadd.f32 %v2410_v4, %v3408_v32  ;;  %v1029_v6 = vpop.f32.mrb[27].mxu1  ;;  %2452 = vmatmul.mubr.bf16.gmra.mrb[20].mxu0 %v1156_v60  ;;  %v1131_v8 = vmax.f32 %v1035_v63, 0.0 }
 0x2a2   : > { %v1030_v7 = vadd.f32 %v3408_v32, %v1029_v6  ;;  %v1129_v10 = vmax.f32 %v1027_v2, 0.0 }
 0x2a3   : > { %v1132_v9 = vmax.f32 %v1038_v5, 0.0 }
 0x2a4   : > { %v1130_v11 = vmax.f32 %v1030_v7, 0.0 }
 0x2a5   : > { %v1158_v12 = vpack.c.bf16 %v1132_v9, %v1131_v8 }
 0x2a6   : > { %v1157_v13 = vpack.c.bf16 %v1130_v11, %v1129_v10  ;;  %v2413_v14 = vpop.f32.mrb[28].mxu1 }
 0x2a7   : > { %v1051_v15 = vadd.f32 %v2413_v14, %v3408_v32  ;;  %v1042_v16 = vpop.f32.mrb[29].mxu1 }
 0x2a8   : > { %v1043_v17 = vadd.f32 %v3408_v32, %v1042_v16  ;;  %v2414_v18 = vpop.f32.mrb[30].mxu1  ;;  %2455 = vmatprep.mubr.bf16.mxu0 %v1157_v13 }
 0x2a9   : > { %v1054_v19 = vadd.f32 %v2414_v18, %v3408_v32  ;;  %v1045_v20 = vpop.f32.mrb[31].mxu1  ;;  %2456 = vmatmul.mubr.bf16.gmra.mrb[24].mxu0 %v1158_v12  ;;  %v1135_v22 = vmax.f32 %v1051_v15, 0.0 }
 0x2aa   : > { %v1046_v21 = vadd.f32 %v3408_v32, %v1045_v20  ;;  %v1133_v24 = vmax.f32 %v1043_v17, 0.0 }
 0x2ab   : > { %v1136_v23 = vmax.f32 %v1054_v19, 0.0 }
 0x2ac   : > { %v1134_v25 = vmax.f32 %v1046_v21, 0.0  ;;  %v2739_v21 = vld [vmem:[#allocation10 + $0x38] sm:$0xff]  }
 0x2ad   : > { %v1160_v38 = vpack.c.bf16 %v1136_v23, %v1135_v22  ;;  %2493 = vmatprep.subr.bf16.mxu1 %v2739_v21  ;;  %v2740_v22 = vld [vmem:[#allocation11] sm:$0xff]   ;;  %v2741_v23 = vld [vmem:[#allocation11 + $0x8] sm:$0xff]  }
 0x2ae   : > { %v1159_v26 = vpack.c.bf16 %v1134_v25, %v1133_v24  ;;  %v2417_v27 = vpop.f32.mrb[32].mxu1  ;;  %2494 = vmatpush3.bf16.msra.mxu1 %v2739_v21  ;;  %2527 = vmatprep.subr.bf16.mxu0 %v2740_v22  ;;  %v2742_v24 = vld [vmem:[#allocation11 + $0x10] sm:$0xff]   ;;  %v2744_v25 = vld [vmem:[#allocation11 + $0x20] sm:$0xff]  }
 0x2af   : > { %v1067_v29 = vadd.f32 %v2417_v27, %v3408_v32  ;;  %v1058_v0 = vpop.f32.mrb[33].mxu1  ;;  %2528 = vmatpush3.bf16.msra.mxu0 %v2740_v22  ;;  %v3445_v27 = vld [vmem:[%s3645_s6] ss:$0 sm:$0xff] }
 0x2b0   : > { %v1059_v3 = vadd.f32 %v3408_v32, %v1058_v0  ;;  %v2418_v28 = vpop.f32.mrb[34].mxu1  ;;  %2459 = vmatprep.mubr.bf16.mxu0 %v1159_v26  ;;  %2529 = vmatprep.subr.bf16.mxu0 %v2741_v23  ;;  %v2746_v26 = vld [vmem:[#allocation11 + $0x30] sm:$0xff]  }
 0x2b1   : > { %v1070_v30 = vadd.f32 %v2418_v28, %v3408_v32  ;;  %v1061_v31 = vpop.f32.mrb[35].mxu1  ;;  %2460 = vmatmul.mubr.bf16.gmra.mrb[28].mxu0 %v1160_v38  ;;  %v1139_v34 = vmax.f32 %v1067_v29, 0.0  ;;  %v2745_v38 = vld [vmem:[#allocation11 + $0x28] sm:$0xff]  }
 0x2b2   : > { %v1062_v33 = vadd.f32 %v3408_v32, %v1061_v31  ;;  %v1137_v36 = vmax.f32 %v1059_v3, 0.0 }
 0x2b3   : > { %v1140_v35 = vmax.f32 %v1070_v30, 0.0  ;;  %2530 = vmatpush3.bf16.msra.mxu0 %v2741_v23 }
 0x2b4   : > { %v1138_v37 = vmax.f32 %v1062_v33, 0.0  ;;  %2531 = vmatprep.subr.bf16.mxu0 %v2742_v24 }
 0x2b5   : > { %v1162_v39 = vpack.c.bf16 %v1140_v35, %v1139_v34 }
 0x2b6   : > { %v1161_v40 = vpack.c.bf16 %v1138_v37, %v1137_v36  ;;  %v2421_v41 = vpop.f32.mrb[36].mxu1 }
 0x2b7   : > { %v1083_v42 = vadd.f32 %v2421_v41, %v3408_v32  ;;  %v1074_v43 = vpop.f32.mrb[37].mxu1  ;;  %2532 = vmatpush3.bf16.msra.mxu0 %v2742_v24 }
 0x2b8   : > { %v1075_v44 = vadd.f32 %v3408_v32, %v1074_v43  ;;  %v2422_v45 = vpop.f32.mrb[38].mxu1  ;;  %2463 = vmatprep.mubr.bf16.mxu0 %v1161_v40 }
 0x2b9   : > { %v1086_v46 = vadd.f32 %v2422_v45, %v3408_v32  ;;  %v1077_v47 = vpop.f32.mrb[39].mxu1  ;;  %2464 = vmatmul.mubr.bf16.gmra.mrb[32].mxu0 %v1162_v39  ;;  %v1143_v49 = vmax.f32 %v1083_v42, 0.0 }
 0x2ba   : > { %v1078_v48 = vadd.f32 %v3408_v32, %v1077_v47  ;;  %v1141_v51 = vmax.f32 %v1075_v44, 0.0 }
 0x2bb   : > { %v1144_v50 = vmax.f32 %v1086_v46, 0.0 }
 0x2bc   : > { %v1142_v52 = vmax.f32 %v1078_v48, 0.0 }
 0x2bd   : > { %v1164_v53 = vpack.c.bf16 %v1144_v50, %v1143_v49 }
 0x2be   : > { %v1163_v54 = vpack.c.bf16 %v1142_v52, %v1141_v51  ;;  %v2425_v55 = vpop.f32.mrb[40].mxu1 }
 0x2bf   : > { %v1099_v56 = vadd.f32 %v2425_v55, %v3408_v32  ;;  %v1090_v57 = vpop.f32.mrb[41].mxu1 }
 0x2c0   : > { %v1091_v58 = vadd.f32 %v3408_v32, %v1090_v57  ;;  %v2426_v59 = vpop.f32.mrb[42].mxu1  ;;  %2467 = vmatprep.mubr.bf16.mxu0 %v1163_v54 }
 0x2c1   : > { %v1102_v60 = vadd.f32 %v2426_v59, %v3408_v32  ;;  %v1093_v61 = vpop.f32.mrb[43].mxu1  ;;  %2468 = vmatmul.mubr.bf16.gmra.mrb[36].mxu0 %v1164_v53  ;;  %v1147_v63 = vmax.f32 %v1099_v56, 0.0 }
 0x2c2   : > { %v1094_v62 = vadd.f32 %v3408_v32, %v1093_v61  ;;  %v1145_v2 = vmax.f32 %v1091_v58, 0.0 }
 0x2c3   : > { %v1148_v1 = vmax.f32 %v1102_v60, 0.0 }
 0x2c4   : > { %v1146_v4 = vmax.f32 %v1094_v62, 0.0 }
 0x2c5   : > { %v1166_v5 = vpack.c.bf16 %v1148_v1, %v1147_v63 }
 0x2c6   : > { %v1165_v6 = vpack.c.bf16 %v1146_v4, %v1145_v2  ;;  %v2429_v7 = vpop.f32.mrb[44].mxu1 }
 0x2c7   : > { %v1115_v8 = vadd.f32 %v2429_v7, %v3408_v32  ;;  %v1106_v9 = vpop.f32.mrb[45].mxu1 }
 0x2c8   : > { %v1107_v10 = vadd.f32 %v3408_v32, %v1106_v9  ;;  %v2430_v11 = vpop.f32.mrb[46].mxu1  ;;  %2471 = vmatprep.mubr.bf16.mxu0 %v1165_v6 }
 0x2c9   : > { %v1118_v12 = vadd.f32 %v2430_v11, %v3408_v32  ;;  %v1109_v13 = vpop.f32.mrb[47].mxu1  ;;  %2472 = vmatmul.mubr.bf16.gmra.mrb[40].mxu0 %v1166_v5  ;;  %v1151_v15 = vmax.f32 %v1115_v8, 0.0 }
 0x2ca   : > { %v1110_v14 = vadd.f32 %v3408_v32, %v1109_v13  ;;  %v1149_v17 = vmax.f32 %v1107_v10, 0.0  ;;  %v2743_v32 = vld [vmem:[#allocation11 + $0x18] sm:$0xff]  }
 0x2cb   : > { %v1152_v16 = vmax.f32 %v1118_v12, 0.0  ;;  %2533 = vmatprep.subr.bf16.mxu0 %v2743_v32 }
 0x2cc   : > { %v1150_v18 = vmax.f32 %v1110_v14, 0.0  ;;  %2534 = vmatpush3.bf16.msra.mxu0 %v2743_v32 }
 0x2cd   : > { %v1168_v19 = vpack.c.bf16 %v1152_v16, %v1151_v15  ;;  %2535 = vmatprep.subr.bf16.mxu0 %v2744_v25 }
 0x2ce   : > { %v1167_v20 = vpack.c.bf16 %v1150_v18, %v1149_v17 }
 0x2d0   : > { %2475 = vmatprep.mubr.bf16.mxu0 %v1167_v20  ;;  %2536 = vmatpush3.bf16.msra.mxu0 %v2744_v25 }
 0x2d1   : > { %2476 = vmatmul.mubr.bf16.gmra.mrb[44].mxu0 %v1168_v19  ;;  %2537 = vmatprep.subr.bf16.mxu0 %v2745_v38 }
 0x2d4   : > { %2538 = vmatpush3.bf16.msra.mxu0 %v2745_v38 }
 0x2d5   : > { %2539 = vmatprep.subr.bf16.mxu0 %v2746_v26 }
 0x2d8   : > { %2540 = vmatpush3.bf16.msra.mxu0 %v2746_v26 }
 0x36c   : > { %v2449_v29 = vpop.f32.mrb[16].mxu0 }
 0x36d   : > { %v1283_v0 = vadd.f32 %v2449_v29, %v3445_v27  ;;  %v1274_v3 = vpop.f32.mrb[17].mxu0 }
 0x36e   : > { %v1275_v28 = vadd.f32 %v3445_v27, %v1274_v3  ;;  %v2450_v30 = vpop.f32.mrb[18].mxu0 }
 0x36f   : > { %v1286_v31 = vadd.f32 %v2450_v30, %v3445_v27  ;;  %v1277_v33 = vpop.f32.mrb[19].mxu0  ;;  %v1403_v35 = vmax.f32 %v1283_v0, 0.0 }
 0x370   : > { %v1278_v34 = vadd.f32 %v3445_v27, %v1277_v33  ;;  %v1401_v37 = vmax.f32 %v1275_v28, 0.0 }
 0x371   : > { %v1404_v36 = vmax.f32 %v1286_v31, 0.0 }
 0x372   : > { %v1402_v39 = vmax.f32 %v1278_v34, 0.0 }
 0x373   : > { %v1434_v40 = vpack.c.bf16 %v1404_v36, %v1403_v35 }
 0x374   : > { %v1433_v41 = vpack.c.bf16 %v1402_v39, %v1401_v37  ;;  %v2453_v42 = vpop.f32.mrb[20].mxu0 }
 0x375   : > { %v1299_v43 = vadd.f32 %v2453_v42, %v3445_v27  ;;  %v1290_v44 = vpop.f32.mrb[21].mxu0 }
 0x376   : > { %v1291_v45 = vadd.f32 %v3445_v27, %v1290_v44  ;;  %v2454_v46 = vpop.f32.mrb[22].mxu0  ;;  %2495 = vmatprep.mubr.bf16.mxu1 %v1433_v41 }
 0x377   : > { %v1302_v47 = vadd.f32 %v2454_v46, %v3445_v27  ;;  %v1293_v48 = vpop.f32.mrb[23].mxu0  ;;  %2496 = vmatmul.mubr.bf16.vlgmr.msra.gmra.mrb[48].mxu1 %v1434_v40  ;;  %v1407_v50 = vmax.f32 %v1299_v43, 0.0 }
 0x378   : > { %v1294_v49 = vadd.f32 %v3445_v27, %v1293_v48  ;;  %v1405_v52 = vmax.f32 %v1291_v45, 0.0 }
 0x379   : > { %v1408_v51 = vmax.f32 %v1302_v47, 0.0 }
 0x37a   : > { %v1406_v53 = vmax.f32 %v1294_v49, 0.0 }
 0x37b   : > { %v1436_v54 = vpack.c.bf16 %v1408_v51, %v1407_v50 }
 0x37c   : > { %v1435_v55 = vpack.c.bf16 %v1406_v53, %v1405_v52  ;;  %v2457_v56 = vpop.f32.mrb[24].mxu0 }
 0x37d   : > { %v1315_v57 = vadd.f32 %v2457_v56, %v3445_v27  ;;  %v1306_v58 = vpop.f32.mrb[25].mxu0 }
 0x37e   : > { %v1307_v59 = vadd.f32 %v3445_v27, %v1306_v58  ;;  %v2458_v60 = vpop.f32.mrb[26].mxu0  ;;  %2499 = vmatprep.mubr.bf16.mxu1 %v1435_v55 }
 0x37f   : > { %v1318_v61 = vadd.f32 %v2458_v60, %v3445_v27  ;;  %v1309_v62 = vpop.f32.mrb[27].mxu0  ;;  %2500 = vmatmul.mubr.bf16.gmra.mrb[52].mxu1 %v1436_v54  ;;  %v1411_v1 = vmax.f32 %v1315_v57, 0.0 }
 0x380   : > { %v1310_v63 = vadd.f32 %v3445_v27, %v1309_v62  ;;  %v1409_v4 = vmax.f32 %v1307_v59, 0.0 }
 0x381   : > { %v1412_v2 = vmax.f32 %v1318_v61, 0.0 }
 0x382   : > { %v1410_v5 = vmax.f32 %v1310_v63, 0.0 }
 0x383   : > { %v1438_v6 = vpack.c.bf16 %v1412_v2, %v1411_v1 }
 0x384   : > { %v1437_v7 = vpack.c.bf16 %v1410_v5, %v1409_v4  ;;  %v2461_v8 = vpop.f32.mrb[28].mxu0 }
 0x385   : > { %v1331_v9 = vadd.f32 %v2461_v8, %v3445_v27  ;;  %v1322_v10 = vpop.f32.mrb[29].mxu0 }
 0x386   : > { %v1323_v11 = vadd.f32 %v3445_v27, %v1322_v10  ;;  %v2462_v12 = vpop.f32.mrb[30].mxu0  ;;  %2503 = vmatprep.mubr.bf16.mxu1 %v1437_v7 }
 0x387   : > { %v1334_v13 = vadd.f32 %v2462_v12, %v3445_v27  ;;  %v1325_v14 = vpop.f32.mrb[31].mxu0  ;;  %2504 = vmatmul.mubr.bf16.gmra.mrb[56].mxu1 %v1438_v6  ;;  %v1415_v16 = vmax.f32 %v1331_v9, 0.0 }
 0x388   : > { %v1326_v15 = vadd.f32 %v3445_v27, %v1325_v14  ;;  %v1413_v18 = vmax.f32 %v1323_v11, 0.0 }
 0x389   : > { %v1416_v17 = vmax.f32 %v1334_v13, 0.0 }
 0x38a   : > { %v1414_v19 = vmax.f32 %v1326_v15, 0.0  ;;  %v2747_v15 = vld [vmem:[#allocation11 + $0x38] sm:$0xff]  }
 0x38b   : > { %v1440_v20 = vpack.c.bf16 %v1416_v17, %v1415_v16  ;;  %2541 = vmatprep.subr.bf16.mxu0 %v2747_v15  ;;  %v3482_v16 = vld [vmem:[%s3677_s22] ss:$0 sm:$0xff]  ;;  %s3006_s22 = smov [#allocation13]  }
 0x38c   : > { %v1439_v21 = vpack.c.bf16 %v1414_v19, %v1413_v18  ;;  %v2465_v22 = vpop.f32.mrb[32].mxu0  ;;  %2542 = vmatpush3.bf16.msra.mxu0 %v2747_v15  ;;  %s2922_s30 = sshll.u32 %s3006_s22, 4  ;;  %s2923_s30 = int_to_ptr.vmem [resolvable:$false] %s2922_s30 }
 0x38d   : > { %v1347_v23 = vadd.f32 %v2465_v22, %v3445_v27  ;;  %v1338_v24 = vpop.f32.mrb[33].mxu0  ;;  %s2924_s29 = scalar_lea.vmem %s2923_s30, 8192  ;;  %p2925_p13 = scmp.lt.s32.totalorder %s3591_s13, %s2923_s30 }
 0x38e   : > { %v1339_v32 = vadd.f32 %v3445_v27, %v1338_v24  ;;  %v2466_v25 = vpop.f32.mrb[34].mxu0  ;;  %2507 = vmatprep.mubr.bf16.mxu1 %v1439_v21  ;;  %p2926_p0 = scmp.lt.s32.totalorder %s2924_s29, %s2918_s28 }
 0x38f   : > { %v1350_v38 = vadd.f32 %v2466_v25, %v3445_v27  ;;  %v1341_v26 = vpop.f32.mrb[35].mxu0  ;;  %2508 = vmatmul.mubr.bf16.gmra.mrb[60].mxu1 %v1440_v20  ;;  %v1419_v0 = vmax.f32 %v1347_v23, 0.0 }
 0x390   : > { %v1342_v29 = vadd.f32 %v3445_v27, %v1341_v26  ;;  %v1417_v28 = vmax.f32 %v1339_v32, 0.0  ;;  %p2927_p2 = por %p2926_p0, %p2925_p13 }
 0x391   : > { %v1420_v3 = vmax.f32 %v1350_v38, 0.0 }
 0x392   : > { %v1418_v30 = vmax.f32 %v1342_v29, 0.0  ;;  %p2928_p8 = pnand %p2927_p2, %p2921_p1 }
 0x393   : > { %v1442_v31 = vpack.c.bf16 %v1420_v3, %v1419_v0 }
 0x394   : > { %v1441_v33 = vpack.c.bf16 %v1418_v30, %v1417_v28  ;;  %v2469_v34 = vpop.f32.mrb[36].mxu0 }
 0x395   : > { %v1363_v35 = vadd.f32 %v2469_v34, %v3445_v27  ;;  %v1354_v36 = vpop.f32.mrb[37].mxu0 }
 0x396   : > { %v1355_v37 = vadd.f32 %v3445_v27, %v1354_v36  ;;  %v2470_v39 = vpop.f32.mrb[38].mxu0  ;;  %2511 = vmatprep.mubr.bf16.mxu1 %v1441_v33 }
 0x397   : > { %v1366_v40 = vadd.f32 %v2470_v39, %v3445_v27  ;;  %v1357_v41 = vpop.f32.mrb[39].mxu0  ;;  %2512 = vmatmul.mubr.bf16.gmra.mrb[64].mxu1 %v1442_v31  ;;  %v1423_v43 = vmax.f32 %v1363_v35, 0.0 }
 0x398   : > { %v1358_v42 = vadd.f32 %v3445_v27, %v1357_v41  ;;  %v1421_v45 = vmax.f32 %v1355_v37, 0.0 }
 0x399   : > { %v1424_v44 = vmax.f32 %v1366_v40, 0.0 }
 0x39a   : > { %v1422_v46 = vmax.f32 %v1358_v42, 0.0 }
 0x39b   : > { %v1444_v47 = vpack.c.bf16 %v1424_v44, %v1423_v43 }
 0x39c   : > { %v1443_v48 = vpack.c.bf16 %v1422_v46, %v1421_v45  ;;  %v2473_v49 = vpop.f32.mrb[40].mxu0 }
 0x39d   : > { %v1379_v50 = vadd.f32 %v2473_v49, %v3445_v27  ;;  %v1370_v51 = vpop.f32.mrb[41].mxu0 }
 0x39e   : > { %v1371_v52 = vadd.f32 %v3445_v27, %v1370_v51  ;;  %v2474_v53 = vpop.f32.mrb[42].mxu0  ;;  %2515 = vmatprep.mubr.bf16.mxu1 %v1443_v48 }
 0x39f   : > { %v1382_v54 = vadd.f32 %v2474_v53, %v3445_v27  ;;  %v1373_v55 = vpop.f32.mrb[43].mxu0  ;;  %2516 = vmatmul.mubr.bf16.gmra.mrb[68].mxu1 %v1444_v47  ;;  %v1427_v57 = vmax.f32 %v1379_v50, 0.0 }
 0x3a0   : > { %v1374_v56 = vadd.f32 %v3445_v27, %v1373_v55  ;;  %v1425_v59 = vmax.f32 %v1371_v52, 0.0 }
 0x3a1   : > { %v1428_v58 = vmax.f32 %v1382_v54, 0.0 }
 0x3a2   : > { %v1426_v60 = vmax.f32 %v1374_v56, 0.0 }
 0x3a3   : > { %v1446_v61 = vpack.c.bf16 %v1428_v58, %v1427_v57 }
 0x3a4   : > { %v1445_v62 = vpack.c.bf16 %v1426_v60, %v1425_v59  ;;  %v2477_v63 = vpop.f32.mrb[44].mxu0 }
 0x3a5   : > { %v1395_v1 = vadd.f32 %v2477_v63, %v3445_v27  ;;  %v1386_v2 = vpop.f32.mrb[45].mxu0 }
 0x3a6   : > { %v1387_v4 = vadd.f32 %v3445_v27, %v1386_v2  ;;  %v2478_v5 = vpop.f32.mrb[46].mxu0  ;;  %2519 = vmatprep.mubr.bf16.mxu1 %v1445_v62 }
 0x3a7   : > { %v1398_v6 = vadd.f32 %v2478_v5, %v3445_v27  ;;  %v1389_v7 = vpop.f32.mrb[47].mxu0  ;;  %2520 = vmatmul.mubr.bf16.gmra.mrb[72].mxu1 %v1446_v61  ;;  %v1431_v9 = vmax.f32 %v1395_v1, 0.0 }
 0x3a8   : > { %v1390_v8 = vadd.f32 %v3445_v27, %v1389_v7  ;;  %v1429_v11 = vmax.f32 %v1387_v4, 0.0 }
 0x3a9   : > { %v1432_v10 = vmax.f32 %v1398_v6, 0.0 }
 0x3aa   : > { %v1430_v12 = vmax.f32 %v1390_v8, 0.0 }
 0x3ab   : > { %v1448_v13 = vpack.c.bf16 %v1432_v10, %v1431_v9 }
 0x3ac   : > { %v1447_v14 = vpack.c.bf16 %v1430_v12, %v1429_v11 }
 0x3ae   : > { %2523 = vmatprep.mubr.bf16.mxu1 %v1447_v14 }
 0x3af   : > { %2524 = vmatmul.mubr.bf16.gmra.mrb[76].mxu1 %v1448_v13 }
 0x44a   : > { %v2497_v17 = vpop.f32.mrb[48].mxu1 }
 0x44b   : > { %v1563_v18 = vadd.f32 %v2497_v17, %v3482_v16  ;;  %v1554_v27 = vpop.f32.mrb[49].mxu1 }
 0x44c   : > { %v1555_v19 = vadd.f32 %v3482_v16, %v1554_v27  ;;  %v2498_v20 = vpop.f32.mrb[50].mxu1 }
 0x44d   : > { %v1566_v21 = vadd.f32 %v2498_v20, %v3482_v16  ;;  %v1557_v22 = vpop.f32.mrb[51].mxu1  ;;  %v1683_v24 = vmax.f32 %v1563_v18, 0.0 }
 0x44e   : > { %v1558_v23 = vadd.f32 %v3482_v16, %v1557_v22  ;;  %v1681_v25 = vmax.f32 %v1555_v19, 0.0 }
 0x44f   : > { %v1684_v32 = vmax.f32 %v1566_v21, 0.0 }
 0x450   : > { %v1682_v38 = vmax.f32 %v1558_v23, 0.0 }
 0x451   : > { %v1714_v26 = vpack.c.bf16 %v1684_v32, %v1683_v24 }
 0x452   : > { %v1713_v29 = vpack.c.bf16 %v1682_v38, %v1681_v25  ;;  %v2501_v0 = vpop.f32.mrb[52].mxu1 }
 0x453   : > { %v1579_v3 = vadd.f32 %v2501_v0, %v3482_v16  ;;  %v1570_v28 = vpop.f32.mrb[53].mxu1 }
 0x454   : > { %v1571_v30 = vadd.f32 %v3482_v16, %v1570_v28  ;;  %v2502_v31 = vpop.f32.mrb[54].mxu1  ;;  %2543 = vmatprep.mubr.bf16.mxu0 %v1713_v29 }
 0x455   : > { %v1582_v33 = vadd.f32 %v2502_v31, %v3482_v16  ;;  %v1573_v34 = vpop.f32.mrb[55].mxu1  ;;  %2544 = vmatmul.mubr.bf16.vlgmr.msra.gmra.mrb[48].mxu0 %v1714_v26  ;;  %v1687_v36 = vmax.f32 %v1579_v3, 0.0 }
 0x456   : > { %v1574_v35 = vadd.f32 %v3482_v16, %v1573_v34  ;;  %v1685_v39 = vmax.f32 %v1571_v30, 0.0 }
 0x457   : > { %v1688_v37 = vmax.f32 %v1582_v33, 0.0 }
 0x458   : > { %v1686_v40 = vmax.f32 %v1574_v35, 0.0 }
 0x459   : > { %v1716_v41 = vpack.c.bf16 %v1688_v37, %v1687_v36 }
 0x45a   : > { %v1715_v42 = vpack.c.bf16 %v1686_v40, %v1685_v39  ;;  %v2505_v43 = vpop.f32.mrb[56].mxu1 }
 0x45b   : > { %v1595_v44 = vadd.f32 %v2505_v43, %v3482_v16  ;;  %v1586_v45 = vpop.f32.mrb[57].mxu1 }
 0x45c   : > { %v1587_v46 = vadd.f32 %v3482_v16, %v1586_v45  ;;  %v2506_v47 = vpop.f32.mrb[58].mxu1  ;;  %2547 = vmatprep.mubr.bf16.mxu0 %v1715_v42 }
 0x45d   : > { %v1598_v48 = vadd.f32 %v2506_v47, %v3482_v16  ;;  %v1589_v49 = vpop.f32.mrb[59].mxu1  ;;  %2548 = vmatmul.mubr.bf16.gmra.mrb[52].mxu0 %v1716_v41  ;;  %v1691_v51 = vmax.f32 %v1595_v44, 0.0 }
 0x45e   : > { %v1590_v50 = vadd.f32 %v3482_v16, %v1589_v49  ;;  %v1689_v53 = vmax.f32 %v1587_v46, 0.0 }
 0x45f   : > { %v1692_v52 = vmax.f32 %v1598_v48, 0.0 }
 0x460   : > { %v1690_v54 = vmax.f32 %v1590_v50, 0.0 }
 0x461   : > { %v1718_v55 = vpack.c.bf16 %v1692_v52, %v1691_v51 }
 0x462   : > { %v1717_v56 = vpack.c.bf16 %v1690_v54, %v1689_v53  ;;  %v2509_v57 = vpop.f32.mrb[60].mxu1 }
 0x463   : > { %v1611_v58 = vadd.f32 %v2509_v57, %v3482_v16  ;;  %v1602_v59 = vpop.f32.mrb[61].mxu1 }
 0x464   : > { %v1603_v60 = vadd.f32 %v3482_v16, %v1602_v59  ;;  %v2510_v61 = vpop.f32.mrb[62].mxu1  ;;  %2551 = vmatprep.mubr.bf16.mxu0 %v1717_v56 }
 0x465   : > { %v1614_v62 = vadd.f32 %v2510_v61, %v3482_v16  ;;  %v1605_v63 = vpop.f32.mrb[63].mxu1  ;;  %2552 = vmatmul.mubr.bf16.gmra.mrb[56].mxu0 %v1718_v55  ;;  %v1695_v2 = vmax.f32 %v1611_v58, 0.0 }
 0x466   : > { %v1606_v1 = vadd.f32 %v3482_v16, %v1605_v63  ;;  %v1693_v5 = vmax.f32 %v1603_v60, 0.0 }
 0x467   : > { %v1696_v4 = vmax.f32 %v1614_v62, 0.0 }
 0x468   : > { %v1694_v6 = vmax.f32 %v1606_v1, 0.0  ;;  %v3520_v1 = vld [vmem:[%s3678_s25] ss:$0 sm:$0xff] }
 0x469   : > { %v1720_v7 = vpack.c.bf16 %v1696_v4, %v1695_v2 }
 0x46a   : > { %v1719_v8 = vpack.c.bf16 %v1694_v6, %v1693_v5  ;;  %v2513_v9 = vpop.f32.mrb[64].mxu1 }
 0x46b   : > { %v1627_v10 = vadd.f32 %v2513_v9, %v3482_v16  ;;  %v1618_v11 = vpop.f32.mrb[65].mxu1 }
 0x46c   : > { %v1619_v12 = vadd.f32 %v3482_v16, %v1618_v11  ;;  %v2514_v13 = vpop.f32.mrb[66].mxu1  ;;  %2555 = vmatprep.mubr.bf16.mxu0 %v1719_v8 }
 0x46d   : > { %v1630_v14 = vadd.f32 %v2514_v13, %v3482_v16  ;;  %v1621_v15 = vpop.f32.mrb[67].mxu1  ;;  %2556 = vmatmul.mubr.bf16.gmra.mrb[60].mxu0 %v1720_v7  ;;  %v1699_v18 = vmax.f32 %v1627_v10, 0.0 }
 0x46e   : > { %v1622_v17 = vadd.f32 %v3482_v16, %v1621_v15  ;;  %v1697_v19 = vmax.f32 %v1619_v12, 0.0 }
 0x46f   : > { %v1700_v27 = vmax.f32 %v1630_v14, 0.0 }
 0x470   : > { %v1698_v20 = vmax.f32 %v1622_v17, 0.0 }
 0x471   : > { %v1722_v21 = vpack.c.bf16 %v1700_v27, %v1699_v18 }
 0x472   : > { %v1721_v22 = vpack.c.bf16 %v1698_v20, %v1697_v19  ;;  %v2517_v23 = vpop.f32.mrb[68].mxu1 }
 0x473   : > { %v1643_v24 = vadd.f32 %v2517_v23, %v3482_v16  ;;  %v1634_v32 = vpop.f32.mrb[69].mxu1 }
 0x474   : > { %v1635_v25 = vadd.f32 %v3482_v16, %v1634_v32  ;;  %v2518_v38 = vpop.f32.mrb[70].mxu1  ;;  %2559 = vmatprep.mubr.bf16.mxu0 %v1721_v22 }
 0x475   : > { %v1646_v26 = vadd.f32 %v2518_v38, %v3482_v16  ;;  %v1637_v29 = vpop.f32.mrb[71].mxu1  ;;  %2560 = vmatmul.mubr.bf16.gmra.mrb[64].mxu0 %v1722_v21  ;;  %v1703_v3 = vmax.f32 %v1643_v24, 0.0 }
 0x476   : > { %v1638_v0 = vadd.f32 %v3482_v16, %v1637_v29  ;;  %v1701_v30 = vmax.f32 %v1635_v25, 0.0 }
 0x477   : > { %v1704_v28 = vmax.f32 %v1646_v26, 0.0 }
 0x478   : > { %v1702_v31 = vmax.f32 %v1638_v0, 0.0 }
 0x479   : > { %v1724_v33 = vpack.c.bf16 %v1704_v28, %v1703_v3 }
 0x47a   : > { %v1723_v34 = vpack.c.bf16 %v1702_v31, %v1701_v30  ;;  %v2521_v35 = vpop.f32.mrb[72].mxu1 }
 0x47b   : > { %v1659_v36 = vadd.f32 %v2521_v35, %v3482_v16  ;;  %v1650_v37 = vpop.f32.mrb[73].mxu1 }
 0x47c   : > { %v1651_v39 = vadd.f32 %v3482_v16, %v1650_v37  ;;  %v2522_v40 = vpop.f32.mrb[74].mxu1  ;;  %2563 = vmatprep.mubr.bf16.mxu0 %v1723_v34 }
 0x47d   : > { %v1662_v41 = vadd.f32 %v2522_v40, %v3482_v16  ;;  %v1653_v42 = vpop.f32.mrb[75].mxu1  ;;  %2564 = vmatmul.mubr.bf16.gmra.mrb[68].mxu0 %v1724_v33  ;;  %v1707_v44 = vmax.f32 %v1659_v36, 0.0 }
 0x47e   : > { %v1654_v43 = vadd.f32 %v3482_v16, %v1653_v42  ;;  %v1705_v46 = vmax.f32 %v1651_v39, 0.0 }
 0x47f   : > { %v1708_v45 = vmax.f32 %v1662_v41, 0.0 }
 0x480   : > { %v1706_v47 = vmax.f32 %v1654_v43, 0.0 }
 0x481   : > { %v1726_v48 = vpack.c.bf16 %v1708_v45, %v1707_v44 }
 0x482   : > { %v1725_v49 = vpack.c.bf16 %v1706_v47, %v1705_v46  ;;  %v2525_v50 = vpop.f32.mrb[76].mxu1 }
 0x483   : > { %v1675_v51 = vadd.f32 %v2525_v50, %v3482_v16  ;;  %v1666_v52 = vpop.f32.mrb[77].mxu1 }
 0x484   : > { %v1667_v53 = vadd.f32 %v3482_v16, %v1666_v52  ;;  %v2526_v54 = vpop.f32.mrb[78].mxu1  ;;  %2567 = vmatprep.mubr.bf16.mxu0 %v1725_v49 }
 0x485   : > { %v1678_v55 = vadd.f32 %v2526_v54, %v3482_v16  ;;  %v1669_v56 = vpop.f32.mrb[79].mxu1  ;;  %2568 = vmatmul.mubr.bf16.gmra.mrb[72].mxu0 %v1726_v48  ;;  %v1711_v58 = vmax.f32 %v1675_v51, 0.0 }
 0x486   : > { %v1670_v57 = vadd.f32 %v3482_v16, %v1669_v56  ;;  %v1709_v60 = vmax.f32 %v1667_v53, 0.0 }
 0x487   : > { %v1712_v59 = vmax.f32 %v1678_v55, 0.0 }
 0x488   : > { %v1710_v61 = vmax.f32 %v1670_v57, 0.0 }
 0x489   : > { %v1728_v62 = vpack.c.bf16 %v1712_v59, %v1711_v58 }
 0x48a   : > { %v1727_v63 = vpack.c.bf16 %v1710_v61, %v1709_v60 }
 0x48c   : > { %2571 = vmatprep.mubr.bf16.mxu0 %v1727_v63 }
 0x48d   : > { %2572 = vmatmul.mubr.bf16.gmra.mrb[76].mxu0 %v1728_v62 }
 0x528   : > { %v2545_v2 = vpop.f32.mrb[48].mxu0 }
 0x529   : > { %v1843_v4 = vadd.f32 %v2545_v2, %v3520_v1  ;;  %v1834_v5 = vpop.f32.mrb[49].mxu0 }
 0x52a   : > { %v1835_v16 = vadd.f32 %v3520_v1, %v1834_v5  ;;  %v2546_v6 = vpop.f32.mrb[50].mxu0 }
 0x52b   : > { %1963 = vst [vmem:[%s3524_s24 + $0x10] sm:$0xff] %v1843_v4  ;;  %v1846_v7 = vadd.f32 %v2546_v6, %v3520_v1  ;;  %v1837_v8 = vpop.f32.mrb[51].mxu0 }
 0x52c   : > { %1961 = vst [vmem:[%s3524_s24] sm:$0xff] %v1835_v16  ;;  %v1838_v9 = vadd.f32 %v3520_v1, %v1837_v8 }
 0x52d   : > { %1964 = vst [vmem:[%s3524_s24 + $0x18] sm:$0xff] %v1846_v7 }
 0x52e   : > { %1962 = vst [vmem:[%s3524_s24 + $0x8] sm:$0xff] %v1838_v9 }
 0x530   : > { %v2549_v10 = vpop.f32.mrb[52].mxu0 }
 0x531   : > { %v1859_v11 = vadd.f32 %v2549_v10, %v3520_v1  ;;  %v1850_v12 = vpop.f32.mrb[53].mxu0 }
 0x532   : > { %v1851_v13 = vadd.f32 %v3520_v1, %v1850_v12  ;;  %v2550_v14 = vpop.f32.mrb[54].mxu0 }
 0x533   : > { %1967 = vst [vmem:[%s3524_s24 + $0x30] sm:$0xff] %v1859_v11  ;;  %v1862_v15 = vadd.f32 %v2550_v14, %v3520_v1  ;;  %v1853_v17 = vpop.f32.mrb[55].mxu0 }
 0x534   : > { %1965 = vst [vmem:[%s3524_s24 + $0x20] sm:$0xff] %v1851_v13  ;;  %v1854_v18 = vadd.f32 %v3520_v1, %v1853_v17 }
 0x535   : > { %1968 = vst [vmem:[%s3524_s24 + $0x38] sm:$0xff] %v1862_v15 }
 0x536   : > { %1966 = vst [vmem:[%s3524_s24 + $0x28] sm:$0xff] %v1854_v18 }
 0x538   : > { %v2553_v27 = vpop.f32.mrb[56].mxu0 }
 0x539   : > { %v1875_v19 = vadd.f32 %v2553_v27, %v3520_v1  ;;  %v1866_v20 = vpop.f32.mrb[57].mxu0 }
 0x53a   : > { %v1867_v21 = vadd.f32 %v3520_v1, %v1866_v20  ;;  %v2554_v22 = vpop.f32.mrb[58].mxu0 }
 0x53b   : > { %1971 = vst [vmem:[%s3524_s24 + $0x50] sm:$0xff] %v1875_v19  ;;  %v1878_v23 = vadd.f32 %v2554_v22, %v3520_v1  ;;  %v1869_v24 = vpop.f32.mrb[59].mxu0 }
 0x53c   : > { %1969 = vst [vmem:[%s3524_s24 + $0x40] sm:$0xff] %v1867_v21  ;;  %v1870_v32 = vadd.f32 %v3520_v1, %v1869_v24 }
 0x53d   : > { %1972 = vst [vmem:[%s3524_s24 + $0x58] sm:$0xff] %v1878_v23 }
 0x53e   : > { %1970 = vst [vmem:[%s3524_s24 + $0x48] sm:$0xff] %v1870_v32 }
 0x540   : > { %v2557_v25 = vpop.f32.mrb[60].mxu0 }
 0x541   : > { %v1891_v38 = vadd.f32 %v2557_v25, %v3520_v1  ;;  %v1882_v26 = vpop.f32.mrb[61].mxu0 }
 0x542   : > { %v1883_v29 = vadd.f32 %v3520_v1, %v1882_v26  ;;  %v2558_v0 = vpop.f32.mrb[62].mxu0 }
 0x543   : > { %1975 = vst [vmem:[%s3524_s24 + $0x70] sm:$0xff] %v1891_v38  ;;  %v1894_v3 = vadd.f32 %v2558_v0, %v3520_v1  ;;  %v1885_v28 = vpop.f32.mrb[63].mxu0 }
 0x544   : > { %1973 = vst [vmem:[%s3524_s24 + $0x60] sm:$0xff] %v1883_v29  ;;  %v1886_v30 = vadd.f32 %v3520_v1, %v1885_v28 }
 0x545   : > { %1976 = vst [vmem:[%s3524_s24 + $0x78] sm:$0xff] %v1894_v3 }
 0x546   : > { %1974 = vst [vmem:[%s3524_s24 + $0x68] sm:$0xff] %v1886_v30 }
 0x548   : > { %v2561_v31 = vpop.f32.mrb[64].mxu0 }
 0x549   : > { %v1907_v33 = vadd.f32 %v2561_v31, %v3520_v1  ;;  %v1898_v34 = vpop.f32.mrb[65].mxu0 }
 0x54a   : > { %v1899_v35 = vadd.f32 %v3520_v1, %v1898_v34  ;;  %v2562_v36 = vpop.f32.mrb[66].mxu0 }
 0x54b   : > { %1979 = vst [vmem:[%s3524_s24 + $0x90] sm:$0xff] %v1907_v33  ;;  %v1910_v37 = vadd.f32 %v2562_v36, %v3520_v1  ;;  %v1901_v39 = vpop.f32.mrb[67].mxu0 }
 0x54c   : > { %1977 = vst [vmem:[%s3524_s24 + $0x80] sm:$0xff] %v1899_v35  ;;  %v1902_v40 = vadd.f32 %v3520_v1, %v1901_v39 }
 0x54d   : > { %1980 = vst [vmem:[%s3524_s24 + $0x98] sm:$0xff] %v1910_v37 }
 0x54e   : > { %1978 = vst [vmem:[%s3524_s24 + $0x88] sm:$0xff] %v1902_v40 }
 0x550   : > { %v2565_v41 = vpop.f32.mrb[68].mxu0 }
 0x551   : > { %v1923_v42 = vadd.f32 %v2565_v41, %v3520_v1  ;;  %v1914_v43 = vpop.f32.mrb[69].mxu0 }
 0x552   : > { %v1915_v44 = vadd.f32 %v3520_v1, %v1914_v43  ;;  %v2566_v45 = vpop.f32.mrb[70].mxu0 }
 0x553   : > { %1983 = vst [vmem:[%s3524_s24 + $0xb0] sm:$0xff] %v1923_v42  ;;  %v1926_v46 = vadd.f32 %v2566_v45, %v3520_v1  ;;  %v1917_v47 = vpop.f32.mrb[71].mxu0 }
 0x554   : > { %1981 = vst [vmem:[%s3524_s24 + $0xa0] sm:$0xff] %v1915_v44  ;;  %v1918_v48 = vadd.f32 %v3520_v1, %v1917_v47 }
 0x555   : > { %1984 = vst [vmem:[%s3524_s24 + $0xb8] sm:$0xff] %v1926_v46 }
 0x556   : > { %1982 = vst [vmem:[%s3524_s24 + $0xa8] sm:$0xff] %v1918_v48 }
 0x558   : > { %v2569_v49 = vpop.f32.mrb[72].mxu0 }
 0x559   : > { %v1939_v50 = vadd.f32 %v2569_v49, %v3520_v1  ;;  %v1930_v51 = vpop.f32.mrb[73].mxu0 }
 0x55a   : > { %v1931_v52 = vadd.f32 %v3520_v1, %v1930_v51  ;;  %v2570_v53 = vpop.f32.mrb[74].mxu0 }
 0x55b   : > { %1987 = vst [vmem:[%s3524_s24 + $0xd0] sm:$0xff] %v1939_v50  ;;  %v1942_v54 = vadd.f32 %v2570_v53, %v3520_v1  ;;  %v1933_v55 = vpop.f32.mrb[75].mxu0 }
 0x55c   : > { %1985 = vst [vmem:[%s3524_s24 + $0xc0] sm:$0xff] %v1931_v52  ;;  %v1934_v56 = vadd.f32 %v3520_v1, %v1933_v55 }
 0x55d   : > { %1988 = vst [vmem:[%s3524_s24 + $0xd8] sm:$0xff] %v1942_v54 }
 0x55e   : > { %1986 = vst [vmem:[%s3524_s24 + $0xc8] sm:$0xff] %v1934_v56 }
 0x560   : > { %v2573_v57 = vpop.f32.mrb[76].mxu0 }
 0x561   : > { %v1955_v58 = vadd.f32 %v2573_v57, %v3520_v1  ;;  %v1946_v59 = vpop.f32.mrb[77].mxu0 }
 0x562   : > { %v1947_v60 = vadd.f32 %v3520_v1, %v1946_v59  ;;  %v2574_v61 = vpop.f32.mrb[78].mxu0 }
 0x563   : > { %1991 = vst [vmem:[%s3524_s24 + $0xf0] sm:$0xff] %v1955_v58  ;;  %v1958_v62 = vadd.f32 %v2574_v61, %v3520_v1  ;;  %v1949_v63 = vpop.f32.mrb[79].mxu0 }
 0x564   : > { %1989 = vst [vmem:[%s3524_s24 + $0xe0] sm:$0xff] %v1947_v60  ;;  %v1950_v2 = vadd.f32 %v3520_v1, %v1949_v63 }
 0x565   : > { %1992 = vst [vmem:[%s3524_s24 + $0xf8] sm:$0xff] %v1958_v62 }
 0x566   : > { %1990 = vst [vmem:[%s3524_s24 + $0xe8] sm:$0xff] %v1950_v2 }
 0x567   : > { %2931 = shalt.err (!%p2928_p8)
}
 0x568   : > { %s2932_s15 = scalar_lea.hbm %s3589_s8, 4096  ;;  %s2936_s12 = scalar_lea.hbm %s3679_s27, 8192 }
 0x569   : > { %p2933_p6 = scmp.ne.s32.totalorder %s3589_s8, %s2932_s15  ;;  %p2937_p3 = scmp.lt.u32.totalorder %s3589_s8, %s3679_s27 }
 0x56a   : > { %p2938_p5 = scmp.lt.u32.totalorder %s2936_s12, %s2932_s15  ;;  %p2940_p7 = scmp.lt.u32.totalorder %s2932_s15, %s3589_s8 }
 0x56b   : > { %p2934_p10 = pnand %p2933_p6, %p3680_p4 }
 0x56c   : > { %p2939_p9 = por %p2938_p5, %p2937_p3 }
 0x56d   : > { %p2935_p11 = pneg %p2934_p10 }
 0x56e   : > { %p2941_p12 = por %p2940_p7, %p2939_p9 }
 0x570   : > { %p2942_p1 = pnand %p2941_p12, %p2935_p11 }
 0x572   : > { %2945 = shalt.err (!%p2942_p1)
}
 0x573   : > { %s3007_s28 = smov 128   ;;  %s3008_s22 = smov 8  }
 0x574   : > { %2613 = dma.vmem_to_hbm [thread:$0]  (%p3680_p4), %s3591_s13, 4096, %s3589_s8, %s1994_s23, %s3007_s28, %s3007_s28, %s3008_s22  }
 0x575 PF: > { %s2022_s30 = sand.u32 1, %s2984_s17   ;;  %p3681_p13 = scmp.ne.s32.totalorder %s3667_s21, 0 }
 0x576   : > { %p3682_p0 = scmp.ge.s32.totalorder %s2996_s20, 2  ;;  %s2023_s29 = scalar_lea.sflag [#allocation4], %s2022_s30 }
 0x578   : > { %p2636_p2 = pnand %p3682_p0, %p3681_p13 }
 0x57a   : > { %2979 = dma.done.wait (!%p2636_p2), %s2023_s29, 4096  }
 0x57b   : > { %2981 = vsyncadd (!%p2636_p2), %s2023_s29, 4294963200  ;;  %p27_p8 = scmp.ge.s32.totalorder %s3242_s16, 4   ;;  %s3683_s17 = smov %s2988_s18 }
 0x57c   : > { %s3684_s18 = smov %s2992_s19  ;;  %s3685_s19 = smov %s3254_s10 }
 0x57d   : > { %s3686_s20 = smov %s3242_s16  ;;  %29 = sbr.rel (!%p27_p8) target bundleno = 13 (0xd), region = 129 }
 0x584   :  { %2028 = vsyncpa [#allocation3], 1 }
 0x585   :  { %2030 = vsyncpa [#allocation3 + $0x1], 1 }
 0x586   :  { %2031 = vsyncpa [#allocation6], 1 }
 0x587   :  { %2032 = vsyncpa [#allocation9], 1 }
 0x588   :  { %2033 = vsyncpa [#allocation12], 1 }
 0x589   :  { %2034 = vsyncpa [#allocation4], 1 }
 0x58a   :  { %2036 = vsyncpa [#allocation4 + $0x1], 1 }

</bundles_post_ra>
